<compile_context>
chip_gen: v7x
topology: tpu7x:2x2x1
jax: 0.10.0
libtpu: 0.0.40
codegen_flags: <defaults>
</compile_context>

<pallas_src>
import functools

import jax
import jax.numpy as jnp
import numpy as np
from jax import lax
from jax.experimental import pallas as pl
from jax.experimental.pallas import tpu as pltpu

_F32 = jnp.float32
_PAD = (8, 128)   # lane-padded per-tile partial-sum block


# ----------------------------------------------------------------------------
# Small helpers: hardware query + tile sizing.
# ----------------------------------------------------------------------------
def _cdiv(a, b):
    return -(-a // b)


def _round_down8(x):
    return (x // 8) * 8


def _vmem_capacity():
    try:
        cap = int(pltpu.get_tpu_info().vmem_capacity_bytes)
        if cap <= 0:
            raise ValueError
        return cap
    except Exception:
        return 64 * 1024 * 1024          # assume the tightest (v7x-class) budget


def _vmem_limit(vmem_cap):
    return int((vmem_cap * 3) // 4)      # leave headroom for compiler scratch


def _cparams(semantics, vmem_bytes):
    return pltpu.CompilerParams(dimension_semantics=semantics,
                                vmem_limit_bytes=int(vmem_bytes))


def _fused_row_tile(L, B, vmem_cap):
    """Row tile for the fused FAPE/lDDT/violation kernel."""
    small_vmem = vmem_cap <= 80 * 1024 * 1024
    cap = 256 if small_vmem else 512                    # bigger tiles on v5e/v6e
    # keep the ~10 live (TR, L) f32 temporaries well inside the VMEM budget
    temp_budget = (20 if small_vmem else 40) * 1024 * 1024
    cap = min(cap, max(8, temp_budget // (40 * max(L, 1))))
    cap = max(8, _round_down8(cap))
    if L <= 8:
        return L
    tr = min(cap, _round_down8(L))
    if B * _cdiv(L, tr) < 2:                            # keep both v7x cores fed
        tr = max(8, _round_down8(_cdiv(L, 2)))
    return max(8, tr)


def _dist_tiles(L, B, no_bins, vmem_cap):
    """(row, col) tiles for the distogram kernel, using lane-PADDED footprints."""
    small_vmem = vmem_cap <= 80 * 1024 * 1024
    target = min((44 if small_vmem else 64) * 1024 * 1024, _vmem_limit(vmem_cap))
    if L <= 128:
        tc = L                                           # block == full column dim
    else:
        tc = 128 * max(1, min(4, L // 128))              # multiple of 128, <= 512, <= L
    padded_bins = max(128, _cdiv(no_bins, 128) * 128)    # 64-bin axis pads to 128 lanes
    row_bytes = tc * padded_bins * 4
    # ~2 double-buffered logits blocks + ~4 block-sized in-kernel temporaries.
    tl = max(8, _round_down8((target - 6 * 1024 * 1024) // (6 * row_bytes)))
    tl = L if L <= 8 else min(tl, _round_down8(L))
    if B * _cdiv(L, tl) * _cdiv(L, tc) < 2 and L > 8:
        tl = max(8, _round_down8(_cdiv(L, 2)))           # >= 2 blocks when B == 1
    return tl, tc


# ----------------------------------------------------------------------------
# Kernel 1: fused FAPE (intra/inter) + lDDT + bond/angle violation partial sums.
# Grid = (B, ceil(L / TR)).
# ----------------------------------------------------------------------------
def _fused_kernel(lhs_ref, rhs_ref, lgt_ref, pcar_ref, lcar_ref,
                  pcac_ref, lcac_ref, tca_ref, tc_ref, nn_ref, nca_ref, w_ref,
                  intra_ref, inter_ref, lddt_ref, viol_ref,
                  *, TR, L, sep, no_bins, cutoff=15.0, eps=1e-10):
    lhs = lhs_ref[0]          # (3i, TR, 7)  rows: [R_pred | -R_label | off_l - off_p]
    rhs = rhs_ref[0]          # (3a, 7, L)   rows: [X_pred ; X_label ; ones]

    row0 = pl.program_id(1) * TR
    r_idx = row0 + lax.broadcasted_iota(jnp.int32, (TR, L), 0)
    c_idx = lax.broadcasted_iota(jnp.int32, (TR, L), 1)
    r_ok = r_idx < L                                     # tail-tile row mask
    same = (r_idx < sep) == (c_idx < sep)
    intra_m = jnp.logical_and(same, r_ok)
    inter_m = jnp.logical_and(jnp.logical_not(same), r_ok)

    # --- FAPE: one (TR,7)@(7,L) MXU matmul per (atom, xyz component); pred,
    # label and the frame translation offset are all folded into the K=7 dot.
    intra_sum = _F32(0.0)
    inter_sum = _F32(0.0)
    for a in range(3):                                   # atoms N, CA, C (unrolled)
        rhs_a = rhs[a]
        sq = jnp.zeros((TR, L), _F32)
        for i in range(3):                               # xyz output component
            di = jnp.dot(lhs[i], rhs_a, preferred_element_type=_F32)
            sq = sq + di * di
        d = jnp.sqrt(sq + 1e-4)
        intra_sum = intra_sum + jnp.sum(
            jnp.where(intra_m, jnp.minimum(d, 10.0), 0.0))
        inter_sum = inter_sum + jnp.sum(
            jnp.where(inter_m, jnp.minimum(d, 30.0), 0.0))
    intra_ref[0, 0] = jnp.full(_PAD, intra_sum, _F32)
    inter_ref[0, 0] = jnp.full(_PAD, inter_sum, _F32)

    # --- lDDT: squared-distance maps via (TR,3)@(3,L) MXU matmuls.
    lgt = lgt_ref[0]          # (TR, no_bins)
    p_rows = pcar_ref[0]      # (TR, 3)  pred CA rows of this tile
    l_rows = lcar_ref[0]
    p_cols = pcac_ref[0]      # (3, L)   pred CA, all columns (transposed)
    l_cols = lcac_ref[0]

    def pair_dist(rows, cols):
        cross = jnp.dot(rows, cols, preferred_element_type=_F32)
        sr = jnp.sum(rows * rows, axis=-1, keepdims=True)
        sc = jnp.sum(cols * cols, axis=0, keepdims=True)
        return jnp.sqrt(eps + jnp.maximum(sr + sc - 2.0 * cross, 0.0))

    dmat_true = pair_dist(l_rows, l_cols)
    dmat_pred = pair_dist(p_rows, p_cols)
    dts = jnp.where(jnp.logical_and(dmat_true < cutoff, r_idx != c_idx), 1.0, 0.0)
    dist_l1 = jnp.abs(dmat_true - dmat_pred)
    score = 0.25 * ((dist_l1 < 0.5).astype(_F32) + (dist_l1 < 1.0).astype(_F32)
                    + (dist_l1 < 2.0).astype(_F32) + (dist_l1 < 4.0).astype(_F32))
    norm = 1.0 / (eps + jnp.sum(dts, axis=-1, keepdims=True))
    res_score = norm * (eps + jnp.sum(dts * score, axis=-1, keepdims=True))  # (TR,1)
    # TODO(synk): torch .detach() on the score is a no-op for this forward-only kernel.
    bin_idx = jnp.minimum(jnp.floor(res_score * float(no_bins)),
                          float(no_bins - 1)).astype(jnp.int32)
    m = jnp.max(lgt, axis=-1, keepdims=True)
    lse = m + jnp.log(jnp.sum(jnp.exp(lgt - m), axis=-1, keepdims=True))      # (TR,1)
    bins_iota = lax.broadcasted_iota(jnp.int32, (TR, no_bins), 1)
    sel = jnp.sum(jnp.where(bins_iota == bin_idx, lgt, 0.0),
                  axis=-1, keepdims=True)
    row_ok = (row0 + lax.broadcasted_iota(jnp.int32, (TR, 1), 0)) < L
    lddt_ref[0, 0] = jnp.full(
        _PAD, jnp.sum(jnp.where(row_ok, lse - sel, 0.0)), _F32)

    # --- bond / angle violation terms: O(L), computed once per batch element.
    is_first = pl.program_id(1) == 0

    @pl.when(is_first)
    def _():
        tca = tca_ref[0]       # (3, M)  this CA (xyz on sublanes, residues on lanes)
        tc = tc_ref[0]         # this C
        nn_ = nn_ref[0]        # next N
        nca = nca_ref[0]       # next CA
        w = w_ref[...]         # (1, M)  per-residue weight 1/(B*M_chain)
        eps_b = 1e-6
        tol = 12.0

        def sq_norm(v):
            return jnp.sum(v * v, axis=0, keepdims=True)   # (1, M)

        c_n_len = jnp.sqrt(eps_b + sq_norm(tc - nn_))
        ca_c_len = jnp.sqrt(eps_b + sq_norm(tca - tc))
        n_ca_len = jnp.sqrt(eps_b + sq_norm(nn_ - nca))
        c_ca_unit = (tca - tc) / ca_c_len
        c_n_unit = (nn_ - tc) / c_n_len
        n_ca_unit = (nca - nn_) / n_ca_len

        l_bond = jnp.maximum(
            jnp.sqrt(eps_b + (c_n_len - 1.329) ** 2) - tol * 0.014, 0.0)
        cos1 = jnp.sum(c_ca_unit * c_n_unit, axis=0, keepdims=True)
        l_ang1 = jnp.maximum(
            jnp.sqrt(eps_b + (cos1 + 0.4473) ** 2) - tol * 0.014, 0.0)
        cos2 = jnp.sum(-c_n_unit * n_ca_unit, axis=0, keepdims=True)
        l_ang2 = jnp.maximum(
            jnp.sqrt(eps_b + (cos2 + 0.5203) ** 2) - tol * 0.03, 0.0)
        viol_ref[0, 0] = jnp.full(
            _PAD, jnp.sum((l_bond + l_ang1 + l_ang2) * w), _F32)

    @pl.when(jnp.logical_not(is_first))
    def _():
        viol_ref[0, 0] = jnp.zeros(_PAD, _F32)


def fused_structure_losses(pred_coords, pred_rotat, pred_trans,
                           label_coords, label_rotat, label_trans,
                           lddt_logits, sep):
    B, L = pred_coords.shape[0], pred_coords.shape[1]
    no_bins = lddt_logits.shape[-1]

    # -------- O(L) glue: merged FAPE matmul operands --------------------------
    # off[b, r, i] = sum_j trans[b, r, j] * rotat[b, r, j, i]
    off_p = jnp.einsum("brj,brji->bri", pred_trans, pred_rotat)
    off_l = jnp.einsum("brj,brji->bri", label_trans, label_rotat)
    doff = jnp.transpose(off_l - off_p, (0, 2, 1))[..., None]       # (B, 3i, L, 1)
    Rp = jnp.transpose(pred_rotat, (0, 3, 1, 2))                    # (B, 3i, L, 3j)
    Rl = jnp.transpose(label_rotat, (0, 3, 1, 2))
    lhs = jnp.concatenate([Rp, -Rl, doff], axis=-1).astype(_F32)    # (B, 3, L, 7)

    Xp = jnp.transpose(pred_coords, (0, 2, 3, 1))                   # (B, 3a, 3j, L)
    Xl = jnp.transpose(label_coords, (0, 2, 3, 1))
    ones = jnp.ones((B, 3, 1, L), _F32)
    rhs = jnp.concatenate([Xp, Xl, ones], axis=2).astype(_F32)      # (B, 3a, 7, L)

    pred_ca = pred_coords[:, :, 1, :].astype(_F32)                  # (B, L, 3)
    label_ca = label_coords[:, :, 1, :].astype(_F32)
    pred_ca_T = jnp.transpose(pred_ca, (0, 2, 1))                   # (B, 3, L)
    label_ca_T = jnp.transpose(label_ca, (0, 2, 1))

    # -------- O(L) glue: per-chain bond/angle operands (lane-dense) ----------
    M1, M2 = sep - 1, L - sep - 1

    def chain_parts(c):
        return (c[:, :-1, 1, :], c[:, :-1, 2, :], c[:, 1:, 0, :], c[:, 1:, 1, :])

    p1 = chain_parts(pred_coords[:, :sep])
    p2 = chain_parts(pred_coords[:, sep:])
    bond_parts = [jnp.transpose(jnp.concatenate([a, b], axis=1), (0, 2, 1))
                  .astype(_F32) for a, b in zip(p1, p2)]            # 4 x (B, 3, M)
    M = M1 + M2
    w = jnp.concatenate([jnp.full((M1,), 1.0 / (B * M1), _F32),
                         jnp.full((M2,), 1.0 / (B * M2), _F32)])[None, :]    # (1, M)

    vmem_cap = _vmem_capacity()
    TR = _fused_row_tile(L, B, vmem_cap)
    nT = _cdiv(L, TR)

    kernel = functools.partial(_fused_kernel, TR=TR, L=L, sep=sep, no_bins=no_bins)
    part_spec = pl.BlockSpec((1, 1) + _PAD, lambda b, i: (b, i, 0, 0))
    part_shape = jax.ShapeDtypeStruct((B, nT) + _PAD, _F32)

    intra_p, inter_p, lddt_p, viol_p = pl.pallas_call(
        kernel,
        grid=(B, nT),
        in_specs=[
            pl.BlockSpec((1, 3, TR, 7), lambda b, i: (b, 0, i, 0)),
            pl.BlockSpec((1, 3, 7, L), lambda b, i: (b, 0, 0, 0)),
            pl.BlockSpec((1, TR, no_bins), lambda b, i: (b, i, 0)),
            pl.BlockSpec((1, TR, 3), lambda b, i: (b, i, 0)),
            pl.BlockSpec((1, TR, 3), lambda b, i: (b, i, 0)),
            pl.BlockSpec((1, 3, L), lambda b, i: (b, 0, 0)),
            pl.BlockSpec((1, 3, L), lambda b, i: (b, 0, 0)),
            pl.BlockSpec((1, 3, M), lambda b, i: (b, 0, 0)),
            pl.BlockSpec((1, 3, M), lambda b, i: (b, 0, 0)),
            pl.BlockSpec((1, 3, M), lambda b, i: (b, 0, 0)),
            pl.BlockSpec((1, 3, M), lambda b, i: (b, 0, 0)),
            pl.BlockSpec((1, M), lambda b, i: (0, 0)),
        ],
        out_specs=(part_spec, part_spec, part_spec, part_spec),
        out_shape=(part_shape, part_shape, part_shape, part_shape),
        compiler_params=_cparams(("parallel", "parallel"), _vmem_limit(vmem_cap)),
    )(lhs, rhs, lddt_logits.astype(_F32), pred_ca, label_ca,
      pred_ca_T, label_ca_T, *bond_parts, w)

    n_intra = float(B * 3 * (sep * sep + (L - sep) * (L - sep)))
    n_inter = float(B * 3 * 2 * sep * (L - sep))
    intra = jnp.sum(intra_p[:, :, 0, 0]) / n_intra
    inter = jnp.sum(inter_p[:, :, 0, 0]) / n_inter
    lddt_loss_val = jnp.sum(lddt_p[:, :, 0, 0]) / float(B * L)
    viol = 0.5 * jnp.sum(viol_p[:, :, 0, 0])
    return intra, inter, lddt_loss_val, viol


# ----------------------------------------------------------------------------
# Kernel 2: distogram cross-entropy partial sums, grid = (B, nTr, nTc).
# ----------------------------------------------------------------------------
def _distogram_kernel(logits_ref, cbr_ref, cbc_ref, out_ref, *, TL, TC, L,
                      min_bin=2.3125, max_bin=21.6875, no_bins=64):
    lgt = logits_ref[0]          # (TL, TC, no_bins)
    xr = cbr_ref[0]              # (TL, 3)   CB rows of this tile
    xct = cbc_ref[0]             # (3, TC)   CB columns of this tile (transposed)

    # pairwise distances via one small MXU matmul (lane-dense (TL, TC) map)
    cross = jnp.dot(xr, xct, preferred_element_type=_F32)
    sr = jnp.sum(xr * xr, axis=-1, keepdims=True)
    sc = jnp.sum(xct * xct, axis=0, keepdims=True)
    d = jnp.sqrt(jnp.maximum(sr + sc - 2.0 * cross, 0.0))

    # closed-form uniform binning == counting (d^2 > boundary^2)
    step = (max_bin - min_bin) / float(no_bins - 2)
    true_bins = jnp.clip(jnp.floor((d - min_bin) / step) + 1.0,
                         0.0, float(no_bins - 1)).astype(jnp.int32)

    row0 = pl.program_id(1) * TL
    col0 = pl.program_id(2) * TC
    r_idx = row0 + lax.broadcasted_iota(jnp.int32, (TL, TC), 0)
    c_idx = col0 + lax.broadcasted_iota(jnp.int32, (TL, TC), 1)
    valid = jnp.logical_and(r_idx < L, c_idx < L)
    true_bins = jnp.where(valid, true_bins, -1)     # padded pairs never match a bin

    m = jnp.max(lgt, axis=-1)                                              # (TL, TC)
    lse = m + jnp.log(jnp.sum(jnp.exp(lgt - m[..., None]), axis=-1))
    bins_iota = lax.broadcasted_iota(jnp.int32, (TL, TC, no_bins), 2)
    # only sum(lse - sel) is emitted: one full-array sum for the selected logits
    # instead of another 64-wide per-pair lane reduction.
    total_sel = jnp.sum(jnp.where(bins_iota == true_bins[..., None], lgt, 0.0))
    out_ref[0, 0, 0] = jnp.full(
        _PAD, jnp.sum(jnp.where(valid, lse, 0.0)) - total_sel, _F32)


def distogram_loss_pallas(dist_logits, label_coords):
    B, L = dist_logits.shape[0], dist_logits.shape[1]
    no_bins = dist_logits.shape[-1]

    # cheap O(L) CB construction stays in plain JAX glue
    N = label_coords[:, :, 0, :]
    CA = label_coords[:, :, 1, :]
    C = label_coords[:, :, 2, :]
    bv = CA - N
    cv = C - CA
    av = jnp.cross(bv, cv)
    CB = (-0.58273431 * av + 0.56802827 * bv - 0.54067466 * cv + CA).astype(_F32)
    CB_T = jnp.transpose(CB, (0, 2, 1))                                # (B, 3, L)

    vmem_cap = _vmem_capacity()
    TL, TC = _dist_tiles(L, B, no_bins, vmem_cap)
    nTr = _cdiv(L, TL)
    nTc = _cdiv(L, TC)

    kernel = functools.partial(_distogram_kernel, TL=TL, TC=TC, L=L, no_bins=no_bins)
    out = pl.pallas_call(
        kernel,
        grid=(B, nTr, nTc),
        in_specs=[
            # TODO(synk): on v5e, if the per-step DMA is still exposed after the
            # resize, add pipeline_mode=pl.Buffered(3) on this logits BlockSpec.
            pl.BlockSpec((1, TL, TC, no_bins), lambda b, r, c: (b, r, c, 0)),
            pl.BlockSpec((1, TL, 3), lambda b, r, c: (b, r, 0)),
            pl.BlockSpec((1, 3, TC), lambda b, r, c: (b, 0, c)),
        ],
        out_specs=pl.BlockSpec((1, 1, 1) + _PAD, lambda b, r, c: (b, r, c, 0, 0)),
        out_shape=jax.ShapeDtypeStruct((B, nTr, nTc) + _PAD, _F32),
        compiler_params=_cparams(("parallel", "parallel", "parallel"),
                                 _vmem_limit(vmem_cap)),
    )(dist_logits, CB, CB_T)
    return jnp.sum(out[:, :, :, 0, 0]) / float(B * L * L)


# ----------------------------------------------------------------------------
# GeoDockLoss forward (Pallas version).
# ----------------------------------------------------------------------------
def geodock_loss_pallas(out, batch):
    sep = batch["protein1_embeddings"].shape[1]
    intra, inter, lddt_l, viol = fused_structure_losses(
        out["coords"], out["rotat"], out["trans"],
        batch["label_coords"], batch["label_rotat"], batch["label_trans"],
        out["lddt_logits"], sep)
    return {
        "intra_loss": intra,
        "inter_loss": inter,
        "dist_loss": distogram_loss_pallas(out["dist_logits"], batch["label_coords"]),
        "lddt_loss": lddt_l,
        "violation_loss": viol,
    }


# ----------------------------------------------------------------------------
# Pure-JAX reference (direct translation of the PyTorch code) for validation.
# ----------------------------------------------------------------------------
def _ref_geodock_loss(out, batch):
    pred_coords = out["coords"]
    pred_rotat = out["rotat"]
    pred_trans = out["trans"]
    label_coords = batch["label_coords"]
    label_rotat = batch["label_rotat"]
    label_trans = batch["label_trans"]
    sep = batch["protein1_embeddings"].shape[1]

    def get_fape(coords, rotat, trans):
        diff = coords[:, None, :, :, :] - trans[:, :, None, None, :]
        return jnp.einsum("brcaj,brji->brcai", diff, rotat)

    pred_fape = get_fape(pred_coords, pred_rotat, pred_trans)
    label_fape = get_fape(label_coords, label_rotat, label_trans)

    def fape_loss(intra, d_clamp):
        d = jnp.sqrt(jnp.sum((pred_fape - label_fape) ** 2, axis=-1) + 1e-4)
        d = jnp.minimum(d, d_clamp)
        L = d.shape[1]
        r = jnp.arange(L)[:, None] < sep
        c = jnp.arange(L)[None, :] < sep
        same = r == c
        m = same if intra else jnp.logical_not(same)
        mask = jnp.broadcast_to(m.astype(d.dtype)[None, :, :, None], d.shape)
        return jnp.sum(d * mask) / jnp.sum(mask)

    intra_loss = fape_loss(True, 10.0)
    inter_loss = fape_loss(False, 30.0)

    boundaries = jnp.linspace(2.3125, 21.6875, 63).astype(jnp.float32) ** 2
    N = label_coords[:, :, 0]
    CA = label_coords[:, :, 1]
    C = label_coords[:, :, 2]
    bv = CA - N
    cv = C - CA
    av = jnp.cross(bv, cv)
    CB = -0.58273431 * av + 0.56802827 * bv - 0.54067466 * cv + CA
    d2 = jnp.sum((CB[:, :, None, :] - CB[:, None, :, :]) ** 2, axis=-1)
    true_bins = jnp.sum((d2[..., None] > boundaries).astype(jnp.int32), axis=-1)
    ls = jax.nn.log_softmax(out["dist_logits"], axis=-1)
    oh = jax.nn.one_hot(true_bins, 64, dtype=ls.dtype)
    dist_loss = jnp.mean(-jnp.sum(oh * ls, axis=-1))

    eps = 1e-10
    pca = pred_coords[:, :, 1]
    lca = label_coords[:, :, 1]
    dt = jnp.sqrt(eps + jnp.sum((lca[:, :, None] - lca[:, None]) ** 2, axis=-1))
    dp = jnp.sqrt(eps + jnp.sum((pca[:, :, None] - pca[:, None]) ** 2, axis=-1))
    n = pca.shape[1]
    dts = (dt < 15.0).astype(jnp.float32) * (1.0 - jnp.eye(n, dtype=jnp.float32))
    l1 = jnp.abs(dt - dp)
    sc = 0.25 * ((l1 < 0.5).astype(jnp.float32) + (l1 < 1.0).astype(jnp.float32)
                 + (l1 < 2.0).astype(jnp.float32) + (l1 < 4.0).astype(jnp.float32))
    norm = 1.0 / (eps + jnp.sum(dts, axis=-1))
    score = norm * (eps + jnp.sum(dts * sc, axis=-1))
    bi = jnp.minimum(jnp.floor(score * 50.0), 49.0).astype(jnp.int32)
    ls2 = jax.nn.log_softmax(out["lddt_logits"], axis=-1)
    oh2 = jax.nn.one_hot(bi, 50, dtype=ls2.dtype)
    lddt_loss_val = jnp.mean(-jnp.sum(oh2 * ls2, axis=-1))

    def bond_loss(coords):
        e = 1e-6
        this_ca = coords[:, :-1, 1]
        this_c = coords[:, :-1, 2]
        next_n = coords[:, 1:, 0]
        next_ca = coords[:, 1:, 1]
        c_n = jnp.sqrt(e + jnp.sum((this_c - next_n) ** 2, axis=-1))
        ca_c = jnp.sqrt(e + jnp.sum((this_ca - this_c) ** 2, axis=-1))
        n_ca = jnp.sqrt(e + jnp.sum((next_n - next_ca) ** 2, axis=-1))
        c_ca_u = (this_ca - this_c) / ca_c[..., None]
        c_n_u = (next_n - this_c) / c_n[..., None]
        n_ca_u = (next_ca - next_n) / n_ca[..., None]
        t1 = jnp.mean(jnp.maximum(jnp.sqrt(e + (c_n - 1.329) ** 2) - 12.0 * 0.014, 0.0))
        cos1 = jnp.sum(c_ca_u * c_n_u, axis=-1)
        t2 = jnp.mean(jnp.maximum(jnp.sqrt(e + (cos1 + 0.4473) ** 2) - 12.0 * 0.014, 0.0))
        cos2 = jnp.sum(-c_n_u * n_ca_u, axis=-1)
        t3 = jnp.mean(jnp.maximum(jnp.sqrt(e + (cos2 + 0.5203) ** 2) - 12.0 * 0.03, 0.0))
        return t1 + t2 + t3

    viol = 0.5 * (bond_loss(pred_coords[:, :sep]) + bond_loss(pred_coords[:, sep:]))

    return {"intra_loss": intra_loss, "inter_loss": inter_loss,
            "dist_loss": dist_loss, "lddt_loss": lddt_loss_val,
            "violation_loss": viol}


if __name__ == "__main__":
    key = jax.random.PRNGKey(0)
    B, L, sep, D = 2, 8, 4, 32
    ks = jax.random.split(key, 8)
    pred_coords = 4.0 * jax.random.normal(ks[0], (B, L, 3, 3), _F32)
    label_coords = 4.0 * jax.random.normal(ks[1], (B, L, 3, 3), _F32)
    pred_rotat = jax.random.normal(ks[2], (B, L, 3, 3), _F32)
    label_rotat = jax.random.normal(ks[3], (B, L, 3, 3), _F32)
    pred_trans = jax.random.normal(ks[4], (B, L, 3), _F32)
    label_trans = jax.random.normal(ks[5], (B, L, 3), _F32)
    dist_logits = jax.random.normal(ks[6], (B, L, L, 64), _F32)
    lddt_logits = jax.random.normal(ks[7], (B, L, 50), _F32)
    protein1_embeddings = jnp.zeros((B, sep, D), _F32)

    out = {"coords": pred_coords, "rotat": pred_rotat, "trans": pred_trans,
           "dist_logits": dist_logits, "lddt_logits": lddt_logits}
    batch = {"label_coords": label_coords, "label_rotat": label_rotat,
             "label_trans": label_trans, "protein1_embeddings": protein1_embeddings}

    losses = geodock_loss_pallas(out, batch)
    losses = jax.tree_util.tree_map(jax.block_until_ready, losses)

    ref = _ref_geodock_loss(out, batch)
    for name in ("intra_loss", "inter_loss", "dist_loss", "lddt_loss", "violation_loss"):
        kv = float(losses[name])
        rv = float(ref[name])
        assert np.isfinite(kv), (name, kv)
        assert abs(kv - rv) <= 2e-3 + 2e-3 * abs(rv), (name, kv, rv)

    print("KERNEL_OK")
</pallas_src>

<mosaic_0001>
module attributes {stable_mosaic.version = 11 : i64} {
  func.func @_fused_kernel(%arg0: i32, %arg1: i32, %arg2: memref<1x3x8x7xf32, #tpu.memory_space<vmem>>, %arg3: memref<1x3x7x8xf32, #tpu.memory_space<vmem>>, %arg4: memref<1x8x50xf32, #tpu.memory_space<vmem>>, %arg5: memref<1x8x3xf32, #tpu.memory_space<vmem>>, %arg6: memref<1x8x3xf32, #tpu.memory_space<vmem>>, %arg7: memref<1x3x8xf32, #tpu.memory_space<vmem>>, %arg8: memref<1x3x8xf32, #tpu.memory_space<vmem>>, %arg9: memref<1x3x6xf32, #tpu.memory_space<vmem>>, %arg10: memref<1x3x6xf32, #tpu.memory_space<vmem>>, %arg11: memref<1x3x6xf32, #tpu.memory_space<vmem>>, %arg12: memref<1x3x6xf32, #tpu.memory_space<vmem>>, %arg13: memref<1x6xf32, #tpu.memory_space<vmem>>, %arg14: memref<1x1x8x128xf32, #tpu.memory_space<vmem>>, %arg15: memref<1x1x8x128xf32, #tpu.memory_space<vmem>>, %arg16: memref<1x1x8x128xf32, #tpu.memory_space<vmem>>, %arg17: memref<1x1x8x128xf32, #tpu.memory_space<vmem>>) attributes {dimension_semantics = [#tpu.dimension_semantics<parallel>, #tpu.dimension_semantics<parallel>], iteration_bounds = array<i64: 2, 1>, scalar_prefetch = 0 : i64, scratch_operands = 0 : i64, tpu.core_type = #tpu.core_type<tc>, window_params = [{transform_indices = @transform_0, window_bounds = array<i64: 1, 3, 8, 7>}, {transform_indices = @transform_1, window_bounds = array<i64: 1, 3, 7, 8>}, {transform_indices = @transform_2, window_bounds = array<i64: 1, 8, 50>}, {transform_indices = @transform_3, window_bounds = array<i64: 1, 8, 3>}, {transform_indices = @transform_4, window_bounds = array<i64: 1, 8, 3>}, {transform_indices = @transform_5, window_bounds = array<i64: 1, 3, 8>}, {transform_indices = @transform_6, window_bounds = array<i64: 1, 3, 8>}, {transform_indices = @transform_7, window_bounds = array<i64: 1, 3, 6>}, {transform_indices = @transform_8, window_bounds = array<i64: 1, 3, 6>}, {transform_indices = @transform_9, window_bounds = array<i64: 1, 3, 6>}, {transform_indices = @transform_10, window_bounds = array<i64: 1, 3, 6>}, {pipeline_mode = #tpu.pipeline_mode<synchronous>, transform_indices = @transform_11, window_bounds = array<i64: 1, 6>}, {transform_indices = @transform_12, window_bounds = array<i64: 1, 1, 8, 128>}, {transform_indices = @transform_13, window_bounds = array<i64: 1, 1, 8, 128>}, {transform_indices = @transform_14, window_bounds = array<i64: 1, 1, 8, 128>}, {transform_indices = @transform_15, window_bounds = array<i64: 1, 1, 8, 128>}]} {
    %c0 = arith.constant 0 : index
    %c0_0 = arith.constant 0 : index
    %c0_1 = arith.constant 0 : index
    %c0_2 = arith.constant 0 : index
    %0 = vector.load %arg2[%c0, %c0_0, %c0_1, %c0_2] : memref<1x3x8x7xf32, #tpu.memory_space<vmem>>, vector<1x3x8x7xf32>
    %1 = vector.shape_cast %0 : vector<1x3x8x7xf32> to vector<3x8x7xf32>
    %c0_3 = arith.constant 0 : index
    %c0_4 = arith.constant 0 : index
    %c0_5 = arith.constant 0 : index
    %c0_6 = arith.constant 0 : index
    %2 = vector.load %arg3[%c0_3, %c0_4, %c0_5, %c0_6] : memref<1x3x7x8xf32, #tpu.memory_space<vmem>>, vector<1x3x7x8xf32>
    %3 = vector.shape_cast %2 : vector<1x3x7x8xf32> to vector<3x7x8xf32>
    %c8_i32 = arith.constant 8 : i32
    %4 = arith.muli %arg1, %c8_i32 : i32
    %5 = tpu.iota {dimensions = array<i32: 0>} : vector<8x8xi32>
    %6 = vector.broadcast %4 : i32 to vector<8x8xi32>
    %7 = arith.addi %6, %5 : vector<8x8xi32>
    %8 = tpu.iota {dimensions = array<i32: 1>} : vector<8x8xi32>
    %c8_i32_7 = arith.constant 8 : i32
    %9 = vector.broadcast %c8_i32_7 : i32 to vector<8x8xi32>
    %10 = arith.cmpi slt, %7, %9 : vector<8x8xi32>
    %c4_i32 = arith.constant 4 : i32
    %11 = vector.broadcast %c4_i32 : i32 to vector<8x8xi32>
    %12 = arith.cmpi slt, %7, %11 : vector<8x8xi32>
    %c4_i32_8 = arith.constant 4 : i32
    %13 = vector.broadcast %c4_i32_8 : i32 to vector<8x8xi32>
    %14 = arith.cmpi slt, %8, %13 : vector<8x8xi32>
    %15 = arith.xori %12, %14 : vector<8x8xi1>
    %cst = arith.constant dense<true> : vector<8x8xi1>
    %16 = arith.xori %15, %cst : vector<8x8xi1>
    %17 = arith.andi %16, %10 : vector<8x8xi1>
    %cst_9 = arith.constant dense<true> : vector<8x8xi1>
    %18 = arith.xori %16, %cst_9 : vector<8x8xi1>
    %19 = arith.andi %18, %10 : vector<8x8xi1>
    %20 = vector.extract_strided_slice %3 {offsets = [0, 0, 0], sizes = [1, 7, 8], strides = [1, 1, 1]} : vector<3x7x8xf32> to vector<1x7x8xf32>
    %21 = vector.shape_cast %20 : vector<1x7x8xf32> to vector<7x8xf32>
    %cst_10 = arith.constant 0.000000e+00 : f32
    %22 = vector.broadcast %cst_10 : f32 to vector<8x8xf32>
    %23 = vector.extract_strided_slice %1 {offsets = [0, 0, 0], sizes = [1, 8, 7], strides = [1, 1, 1]} : vector<3x8x7xf32> to vector<1x8x7xf32>
    %24 = vector.shape_cast %23 : vector<1x8x7xf32> to vector<8x7xf32>
    %cst_11 = arith.constant dense<0.000000e+00> : vector<8x8xf32>
    %25 = tpu.matmul %24, %21, %cst_11 {dimension_numbers = #tpu.dot_dimension_numbers<[1], [0], [0], [1], [0, 0, 1, 1], [], []>} : vector<8x7xf32>, vector<7x8xf32>, vector<8x8xf32> -> vector<8x8xf32>
    %26 = arith.mulf %25, %25 : vector<8x8xf32>
    %27 = arith.addf %22, %26 : vector<8x8xf32>
    %28 = vector.extract_strided_slice %1 {offsets = [1, 0, 0], sizes = [1, 8, 7], strides = [1, 1, 1]} : vector<3x8x7xf32> to vector<1x8x7xf32>
    %29 = vector.shape_cast %28 : vector<1x8x7xf32> to vector<8x7xf32>
    %cst_12 = arith.constant dense<0.000000e+00> : vector<8x8xf32>
    %30 = tpu.matmul %29, %21, %cst_12 {dimension_numbers = #tpu.dot_dimension_numbers<[1], [0], [0], [1], [0, 0, 1, 1], [], []>} : vector<8x7xf32>, vector<7x8xf32>, vector<8x8xf32> -> vector<8x8xf32>
    %31 = arith.mulf %30, %30 : vector<8x8xf32>
    %32 = arith.addf %27, %31 : vector<8x8xf32>
    %33 = vector.extract_strided_slice %1 {offsets = [2, 0, 0], sizes = [1, 8, 7], strides = [1, 1, 1]} : vector<3x8x7xf32> to vector<1x8x7xf32>
    %34 = vector.shape_cast %33 : vector<1x8x7xf32> to vector<8x7xf32>
    %cst_13 = arith.constant dense<0.000000e+00> : vector<8x8xf32>
    %35 = tpu.matmul %34, %21, %cst_13 {dimension_numbers = #tpu.dot_dimension_numbers<[1], [0], [0], [1], [0, 0, 1, 1], [], []>} : vector<8x7xf32>, vector<7x8xf32>, vector<8x8xf32> -> vector<8x8xf32>
    %36 = arith.mulf %35, %35 : vector<8x8xf32>
    %37 = arith.addf %32, %36 : vector<8x8xf32>
    %cst_14 = arith.constant 9.99999974E-5 : f32
    %38 = vector.broadcast %cst_14 : f32 to vector<8x8xf32>
    %39 = arith.addf %37, %38 : vector<8x8xf32>
    %40 = math.sqrt %39 : vector<8x8xf32>
    %cst_15 = arith.constant 1.000000e+01 : f32
    %41 = vector.broadcast %cst_15 : f32 to vector<8x8xf32>
    %42 = arith.minimumf %40, %41 : vector<8x8xf32>
    %cst_16 = arith.constant 0.000000e+00 : f32
    %43 = vector.broadcast %cst_16 : f32 to vector<8x8xf32>
    %44 = arith.select %17, %42, %43 : vector<8x8xi1>, vector<8x8xf32>
    %45 = vector.shape_cast %44 : vector<8x8xf32> to vector<1x8x8xf32>
    %cst_17 = arith.constant dense<0.000000e+00> : vector<1xf32>
    %46 = vector.multi_reduction <add>, %45, %cst_17 [1, 2] : vector<1x8x8xf32> to vector<1xf32>
    %47 = vector.shape_cast %46 : vector<1xf32> to vector<1x1x1xf32>
    %48 = vector.extract %47[0, 0, 0] : f32 from vector<1x1x1xf32>
    %cst_18 = arith.constant 0.000000e+00 : f32
    %49 = arith.addf %cst_18, %48 : f32
    %cst_19 = arith.constant 3.000000e+01 : f32
    %50 = vector.broadcast %cst_19 : f32 to vector<8x8xf32>
    %51 = arith.minimumf %40, %50 : vector<8x8xf32>
    %cst_20 = arith.constant 0.000000e+00 : f32
    %52 = vector.broadcast %cst_20 : f32 to vector<8x8xf32>
    %53 = arith.select %19, %51, %52 : vector<8x8xi1>, vector<8x8xf32>
    %54 = vector.shape_cast %53 : vector<8x8xf32> to vector<1x8x8xf32>
    %cst_21 = arith.constant dense<0.000000e+00> : vector<1xf32>
    %55 = vector.multi_reduction <add>, %54, %cst_21 [1, 2] : vector<1x8x8xf32> to vector<1xf32>
    %56 = vector.shape_cast %55 : vector<1xf32> to vector<1x1x1xf32>
    %57 = vector.extract %56[0, 0, 0] : f32 from vector<1x1x1xf32>
    %cst_22 = arith.constant 0.000000e+00 : f32
    %58 = arith.addf %cst_22, %57 : f32
    %59 = vector.extract_strided_slice %3 {offsets = [1, 0, 0], sizes = [1, 7, 8], strides = [1, 1, 1]} : vector<3x7x8xf32> to vector<1x7x8xf32>
    %60 = vector.shape_cast %59 : vector<1x7x8xf32> to vector<7x8xf32>
    %cst_23 = arith.constant 0.000000e+00 : f32
    %61 = vector.broadcast %cst_23 : f32 to vector<8x8xf32>
    %62 = vector.extract_strided_slice %1 {offsets = [0, 0, 0], sizes = [1, 8, 7], strides = [1, 1, 1]} : vector<3x8x7xf32> to vector<1x8x7xf32>
    %63 = vector.shape_cast %62 : vector<1x8x7xf32> to vector<8x7xf32>
    %cst_24 = arith.constant dense<0.000000e+00> : vector<8x8xf32>
    %64 = tpu.matmul %63, %60, %cst_24 {dimension_numbers = #tpu.dot_dimension_numbers<[1], [0], [0], [1], [0, 0, 1, 1], [], []>} : vector<8x7xf32>, vector<7x8xf32>, vector<8x8xf32> -> vector<8x8xf32>
    %65 = arith.mulf %64, %64 : vector<8x8xf32>
    %66 = arith.addf %61, %65 : vector<8x8xf32>
    %67 = vector.extract_strided_slice %1 {offsets = [1, 0, 0], sizes = [1, 8, 7], strides = [1, 1, 1]} : vector<3x8x7xf32> to vector<1x8x7xf32>
    %68 = vector.shape_cast %67 : vector<1x8x7xf32> to vector<8x7xf32>
    %cst_25 = arith.constant dense<0.000000e+00> : vector<8x8xf32>
    %69 = tpu.matmul %68, %60, %cst_25 {dimension_numbers = #tpu.dot_dimension_numbers<[1], [0], [0], [1], [0, 0, 1, 1], [], []>} : vector<8x7xf32>, vector<7x8xf32>, vector<8x8xf32> -> vector<8x8xf32>
    %70 = arith.mulf %69, %69 : vector<8x8xf32>
    %71 = arith.addf %66, %70 : vector<8x8xf32>
    %72 = vector.extract_strided_slice %1 {offsets = [2, 0, 0], sizes = [1, 8, 7], strides = [1, 1, 1]} : vector<3x8x7xf32> to vector<1x8x7xf32>
    %73 = vector.shape_cast %72 : vector<1x8x7xf32> to vector<8x7xf32>
    %cst_26 = arith.constant dense<0.000000e+00> : vector<8x8xf32>
    %74 = tpu.matmul %73, %60, %cst_26 {dimension_numbers = #tpu.dot_dimension_numbers<[1], [0], [0], [1], [0, 0, 1, 1], [], []>} : vector<8x7xf32>, vector<7x8xf32>, vector<8x8xf32> -> vector<8x8xf32>
    %75 = arith.mulf %74, %74 : vector<8x8xf32>
    %76 = arith.addf %71, %75 : vector<8x8xf32>
    %cst_27 = arith.constant 9.99999974E-5 : f32
    %77 = vector.broadcast %cst_27 : f32 to vector<8x8xf32>
    %78 = arith.addf %76, %77 : vector<8x8xf32>
    %79 = math.sqrt %78 : vector<8x8xf32>
    %cst_28 = arith.constant 1.000000e+01 : f32
    %80 = vector.broadcast %cst_28 : f32 to vector<8x8xf32>
    %81 = arith.minimumf %79, %80 : vector<8x8xf32>
    %cst_29 = arith.constant 0.000000e+00 : f32
    %82 = vector.broadcast %cst_29 : f32 to vector<8x8xf32>
    %83 = arith.select %17, %81, %82 : vector<8x8xi1>, vector<8x8xf32>
    %84 = vector.shape_cast %83 : vector<8x8xf32> to vector<1x8x8xf32>
    %cst_30 = arith.constant dense<0.000000e+00> : vector<1xf32>
    %85 = vector.multi_reduction <add>, %84, %cst_30 [1, 2] : vector<1x8x8xf32> to vector<1xf32>
    %86 = vector.shape_cast %85 : vector<1xf32> to vector<1x1x1xf32>
    %87 = vector.extract %86[0, 0, 0] : f32 from vector<1x1x1xf32>
    %88 = arith.addf %49, %87 : f32
    %cst_31 = arith.constant 3.000000e+01 : f32
    %89 = vector.broadcast %cst_31 : f32 to vector<8x8xf32>
    %90 = arith.minimumf %79, %89 : vector<8x8xf32>
    %cst_32 = arith.constant 0.000000e+00 : f32
    %91 = vector.broadcast %cst_32 : f32 to vector<8x8xf32>
    %92 = arith.select %19, %90, %91 : vector<8x8xi1>, vector<8x8xf32>
    %93 = vector.shape_cast %92 : vector<8x8xf32> to vector<1x8x8xf32>
    %cst_33 = arith.constant dense<0.000000e+00> : vector<1xf32>
    %94 = vector.multi_reduction <add>, %93, %cst_33 [1, 2] : vector<1x8x8xf32> to vector<1xf32>
    %95 = vector.shape_cast %94 : vector<1xf32> to vector<1x1x1xf32>
    %96 = vector.extract %95[0, 0, 0] : f32 from vector<1x1x1xf32>
    %97 = arith.addf %58, %96 : f32
    %98 = vector.extract_strided_slice %3 {offsets = [2, 0, 0], sizes = [1, 7, 8], strides = [1, 1, 1]} : vector<3x7x8xf32> to vector<1x7x8xf32>
    %99 = vector.shape_cast %98 : vector<1x7x8xf32> to vector<7x8xf32>
    %cst_34 = arith.constant 0.000000e+00 : f32
    %100 = vector.broadcast %cst_34 : f32 to vector<8x8xf32>
    %101 = vector.extract_strided_slice %1 {offsets = [0, 0, 0], sizes = [1, 8, 7], strides = [1, 1, 1]} : vector<3x8x7xf32> to vector<1x8x7xf32>
    %102 = vector.shape_cast %101 : vector<1x8x7xf32> to vector<8x7xf32>
    %cst_35 = arith.constant dense<0.000000e+00> : vector<8x8xf32>
    %103 = tpu.matmul %102, %99, %cst_35 {dimension_numbers = #tpu.dot_dimension_numbers<[1], [0], [0], [1], [0, 0, 1, 1], [], []>} : vector<8x7xf32>, vector<7x8xf32>, vector<8x8xf32> -> vector<8x8xf32>
    %104 = arith.mulf %103, %103 : vector<8x8xf32>
    %105 = arith.addf %100, %104 : vector<8x8xf32>
    %106 = vector.extract_strided_slice %1 {offsets = [1, 0, 0], sizes = [1, 8, 7], strides = [1, 1, 1]} : vector<3x8x7xf32> to vector<1x8x7xf32>
    %107 = vector.shape_cast %106 : vector<1x8x7xf32> to vector<8x7xf32>
    %cst_36 = arith.constant dense<0.000000e+00> : vector<8x8xf32>
    %108 = tpu.matmul %107, %99, %cst_36 {dimension_numbers = #tpu.dot_dimension_numbers<[1], [0], [0], [1], [0, 0, 1, 1], [], []>} : vector<8x7xf32>, vector<7x8xf32>, vector<8x8xf32> -> vector<8x8xf32>
    %109 = arith.mulf %108, %108 : vector<8x8xf32>
    %110 = arith.addf %105, %109 : vector<8x8xf32>
    %111 = vector.extract_strided_slice %1 {offsets = [2, 0, 0], sizes = [1, 8, 7], strides = [1, 1, 1]} : vector<3x8x7xf32> to vector<1x8x7xf32>
    %112 = vector.shape_cast %111 : vector<1x8x7xf32> to vector<8x7xf32>
    %cst_37 = arith.constant dense<0.000000e+00> : vector<8x8xf32>
    %113 = tpu.matmul %112, %99, %cst_37 {dimension_numbers = #tpu.dot_dimension_numbers<[1], [0], [0], [1], [0, 0, 1, 1], [], []>} : vector<8x7xf32>, vector<7x8xf32>, vector<8x8xf32> -> vector<8x8xf32>
    %114 = arith.mulf %113, %113 : vector<8x8xf32>
    %115 = arith.addf %110, %114 : vector<8x8xf32>
    %cst_38 = arith.constant 9.99999974E-5 : f32
    %116 = vector.broadcast %cst_38 : f32 to vector<8x8xf32>
    %117 = arith.addf %115, %116 : vector<8x8xf32>
    %118 = math.sqrt %117 : vector<8x8xf32>
    %cst_39 = arith.constant 1.000000e+01 : f32
    %119 = vector.broadcast %cst_39 : f32 to vector<8x8xf32>
    %120 = arith.minimumf %118, %119 : vector<8x8xf32>
    %cst_40 = arith.constant 0.000000e+00 : f32
    %121 = vector.broadcast %cst_40 : f32 to vector<8x8xf32>
    %122 = arith.select %17, %120, %121 : vector<8x8xi1>, vector<8x8xf32>
    %123 = vector.shape_cast %122 : vector<8x8xf32> to vector<1x8x8xf32>
    %cst_41 = arith.constant dense<0.000000e+00> : vector<1xf32>
    %124 = vector.multi_reduction <add>, %123, %cst_41 [1, 2] : vector<1x8x8xf32> to vector<1xf32>
    %125 = vector.shape_cast %124 : vector<1xf32> to vector<1x1x1xf32>
    %126 = vector.extract %125[0, 0, 0] : f32 from vector<1x1x1xf32>
    %127 = arith.addf %88, %126 : f32
    %cst_42 = arith.constant 3.000000e+01 : f32
    %128 = vector.broadcast %cst_42 : f32 to vector<8x8xf32>
    %129 = arith.minimumf %118, %128 : vector<8x8xf32>
    %cst_43 = arith.constant 0.000000e+00 : f32
    %130 = vector.broadcast %cst_43 : f32 to vector<8x8xf32>
    %131 = arith.select %19, %129, %130 : vector<8x8xi1>, vector<8x8xf32>
    %132 = vector.shape_cast %131 : vector<8x8xf32> to vector<1x8x8xf32>
    %cst_44 = arith.constant dense<0.000000e+00> : vector<1xf32>
    %133 = vector.multi_reduction <add>, %132, %cst_44 [1, 2] : vector<1x8x8xf32> to vector<1xf32>
    %134 = vector.shape_cast %133 : vector<1xf32> to vector<1x1x1xf32>
    %135 = vector.extract %134[0, 0, 0] : f32 from vector<1x1x1xf32>
    %136 = arith.addf %97, %135 : f32
    %137 = vector.broadcast %127 : f32 to vector<8x128xf32>
    %c0_45 = arith.constant 0 : index
    %c0_46 = arith.constant 0 : index
    %c0_47 = arith.constant 0 : index
    %c0_48 = arith.constant 0 : index
    %138 = vector.load %arg14[%c0_45, %c0_46, %c0_47, %c0_48] : memref<1x1x8x128xf32, #tpu.memory_space<vmem>>, vector<1x1x8x128xf32>
    %139 = vector.shape_cast %138 : vector<1x1x8x128xf32> to vector<8x128xf32>
    %140 = vector.shape_cast %137 : vector<8x128xf32> to vector<1x1x8x128xf32>
    tpu.vector_store %arg14[%c0_45, %c0_46, %c0_47, %c0_48], %140 {strides = array<i32>} : memref<1x1x8x128xf32, #tpu.memory_space<vmem>>, vector<1x1x8x128xf32>,
    %141 = vector.broadcast %136 : f32 to vector<8x128xf32>
    %c0_49 = arith.constant 0 : index
    %c0_50 = arith.constant 0 : index
    %c0_51 = arith.constant 0 : index
    %c0_52 = arith.constant 0 : index
    %142 = vector.load %arg15[%c0_49, %c0_50, %c0_51, %c0_52] : memref<1x1x8x128xf32, #tpu.memory_space<vmem>>, vector<1x1x8x128xf32>
    %143 = vector.shape_cast %142 : vector<1x1x8x128xf32> to vector<8x128xf32>
    %144 = vector.shape_cast %141 : vector<8x128xf32> to vector<1x1x8x128xf32>
    tpu.vector_store %arg15[%c0_49, %c0_50, %c0_51, %c0_52], %144 {strides = array<i32>} : memref<1x1x8x128xf32, #tpu.memory_space<vmem>>, vector<1x1x8x128xf32>,
    %c0_53 = arith.constant 0 : index
    %c0_54 = arith.constant 0 : index
    %c0_55 = arith.constant 0 : index
    %145 = vector.load %arg4[%c0_53, %c0_54, %c0_55] : memref<1x8x50xf32, #tpu.memory_space<vmem>>, vector<1x8x50xf32>
    %146 = vector.shape_cast %145 : vector<1x8x50xf32> to vector<8x50xf32>
    %c0_56 = arith.constant 0 : index
    %c0_57 = arith.constant 0 : index
    %c0_58 = arith.constant 0 : index
    %147 = vector.load %arg5[%c0_56, %c0_57, %c0_58] : memref<1x8x3xf32, #tpu.memory_space<vmem>>, vector<1x8x3xf32>
    %148 = vector.shape_cast %147 : vector<1x8x3xf32> to vector<8x3xf32>
    %c0_59 = arith.constant 0 : index
    %c0_60 = arith.constant 0 : index
    %c0_61 = arith.constant 0 : index
    %149 = vector.load %arg6[%c0_59, %c0_60, %c0_61] : memref<1x8x3xf32, #tpu.memory_space<vmem>>, vector<1x8x3xf32>
    %150 = vector.shape_cast %149 : vector<1x8x3xf32> to vector<8x3xf32>
    %c0_62 = arith.constant 0 : index
    %c0_63 = arith.constant 0 : index
    %c0_64 = arith.constant 0 : index
    %151 = vector.load %arg7[%c0_62, %c0_63, %c0_64] : memref<1x3x8xf32, #tpu.memory_space<vmem>>, vector<1x3x8xf32>
    %152 = vector.shape_cast %151 : vector<1x3x8xf32> to vector<3x8xf32>
    %c0_65 = arith.constant 0 : index
    %c0_66 = arith.constant 0 : index
    %c0_67 = arith.constant 0 : index
    %153 = vector.load %arg8[%c0_65, %c0_66, %c0_67] : memref<1x3x8xf32, #tpu.memory_space<vmem>>, vector<1x3x8xf32>
    %154 = vector.shape_cast %153 : vector<1x3x8xf32> to vector<3x8xf32>
    %cst_68 = arith.constant dense<0.000000e+00> : vector<8x8xf32>
    %155 = tpu.matmul %150, %154, %cst_68 {dimension_numbers = #tpu.dot_dimension_numbers<[1], [0], [0], [1], [0, 0, 1, 1], [], []>} : vector<8x3xf32>, vector<3x8xf32>, vector<8x8xf32> -> vector<8x8xf32>
    %156 = arith.mulf %150, %150 : vector<8x3xf32>
    %cst_69 = arith.constant dense<0.000000e+00> : vector<8xf32>
    %157 = vector.multi_reduction <add>, %156, %cst_69 [1] : vector<8x3xf32> to vector<8xf32>
    %158 = vector.shape_cast %157 : vector<8xf32> to vector<8x1xf32>
    %159 = arith.mulf %154, %154 : vector<3x8xf32>
    %cst_70 = arith.constant dense<0.000000e+00> : vector<8xf32>
    %160 = vector.multi_reduction <add>, %159, %cst_70 [0] : vector<3x8xf32> to vector<8xf32>
    %161 = vector.shape_cast %160 : vector<8xf32> to vector<1x8xf32>
    %162 = vector.broadcast %158 : vector<8x1xf32> to vector<8x8xf32>
    %163 = vector.broadcast %161 : vector<1x8xf32> to vector<8x8xf32>
    %164 = arith.addf %162, %163 : vector<8x8xf32>
    %cst_71 = arith.constant 2.000000e+00 : f32
    %165 = vector.broadcast %cst_71 : f32 to vector<8x8xf32>
    %166 = arith.mulf %165, %155 : vector<8x8xf32>
    %167 = arith.subf %164, %166 : vector<8x8xf32>
    %cst_72 = arith.constant 0.000000e+00 : f32
    %168 = vector.broadcast %cst_72 : f32 to vector<8x8xf32>
    %169 = arith.maximumf %167, %168 : vector<8x8xf32>
    %cst_73 = arith.constant 1.000000e-10 : f32
    %170 = vector.broadcast %cst_73 : f32 to vector<8x8xf32>
    %171 = arith.addf %170, %169 : vector<8x8xf32>
    %172 = math.sqrt %171 : vector<8x8xf32>
    %cst_74 = arith.constant dense<0.000000e+00> : vector<8x8xf32>
    %173 = tpu.matmul %148, %152, %cst_74 {dimension_numbers = #tpu.dot_dimension_numbers<[1], [0], [0], [1], [0, 0, 1, 1], [], []>} : vector<8x3xf32>, vector<3x8xf32>, vector<8x8xf32> -> vector<8x8xf32>
    %174 = arith.mulf %148, %148 : vector<8x3xf32>
    %cst_75 = arith.constant dense<0.000000e+00> : vector<8xf32>
    %175 = vector.multi_reduction <add>, %174, %cst_75 [1] : vector<8x3xf32> to vector<8xf32>
    %176 = vector.shape_cast %175 : vector<8xf32> to vector<8x1xf32>
    %177 = arith.mulf %152, %152 : vector<3x8xf32>
    %cst_76 = arith.constant dense<0.000000e+00> : vector<8xf32>
    %178 = vector.multi_reduction <add>, %177, %cst_76 [0] : vector<3x8xf32> to vector<8xf32>
    %179 = vector.shape_cast %178 : vector<8xf32> to vector<1x8xf32>
    %180 = vector.broadcast %176 : vector<8x1xf32> to vector<8x8xf32>
    %181 = vector.broadcast %179 : vector<1x8xf32> to vector<8x8xf32>
    %182 = arith.addf %180, %181 : vector<8x8xf32>
    %cst_77 = arith.constant 2.000000e+00 : f32
    %183 = vector.broadcast %cst_77 : f32 to vector<8x8xf32>
    %184 = arith.mulf %183, %173 : vector<8x8xf32>
    %185 = arith.subf %182, %184 : vector<8x8xf32>
    %cst_78 = arith.constant 0.000000e+00 : f32
    %186 = vector.broadcast %cst_78 : f32 to vector<8x8xf32>
    %187 = arith.maximumf %185, %186 : vector<8x8xf32>
    %cst_79 = arith.constant 1.000000e-10 : f32
    %188 = vector.broadcast %cst_79 : f32 to vector<8x8xf32>
    %189 = arith.addf %188, %187 : vector<8x8xf32>
    %190 = math.sqrt %189 : vector<8x8xf32>
    %cst_80 = arith.constant 1.500000e+01 : f32
    %191 = vector.broadcast %cst_80 : f32 to vector<8x8xf32>
    %192 = arith.cmpf olt, %172, %191 : vector<8x8xf32>
    %193 = arith.cmpi ne, %7, %8 : vector<8x8xi32>
    %194 = arith.andi %192, %193 : vector<8x8xi1>
    %cst_81 = arith.constant 1.000000e+00 : f32
    %cst_82 = arith.constant 0.000000e+00 : f32
    %195 = vector.broadcast %cst_81 : f32 to vector<8x8xf32>
    %196 = vector.broadcast %cst_82 : f32 to vector<8x8xf32>
    %197 = arith.select %194, %195, %196 : vector<8x8xi1>, vector<8x8xf32>
    %198 = arith.subf %172, %190 : vector<8x8xf32>
    %199 = math.absf %198 : vector<8x8xf32>
    %cst_83 = arith.constant 5.000000e-01 : f32
    %200 = vector.broadcast %cst_83 : f32 to vector<8x8xf32>
    %201 = arith.cmpf olt, %199, %200 : vector<8x8xf32>
    %202 = arith.extui %201 : vector<8x8xi1> to vector<8x8xi32>
    %203 = arith.sitofp %202 : vector<8x8xi32> to vector<8x8xf32>
    %cst_84 = arith.constant 1.000000e+00 : f32
    %204 = vector.broadcast %cst_84 : f32 to vector<8x8xf32>
    %205 = arith.cmpf olt, %199, %204 : vector<8x8xf32>
    %206 = arith.extui %205 : vector<8x8xi1> to vector<8x8xi32>
    %207 = arith.sitofp %206 : vector<8x8xi32> to vector<8x8xf32>
    %208 = arith.addf %203, %207 : vector<8x8xf32>
    %cst_85 = arith.constant 2.000000e+00 : f32
    %209 = vector.broadcast %cst_85 : f32 to vector<8x8xf32>
    %210 = arith.cmpf olt, %199, %209 : vector<8x8xf32>
    %211 = arith.extui %210 : vector<8x8xi1> to vector<8x8xi32>
    %212 = arith.sitofp %211 : vector<8x8xi32> to vector<8x8xf32>
    %213 = arith.addf %208, %212 : vector<8x8xf32>
    %cst_86 = arith.constant 4.000000e+00 : f32
    %214 = vector.broadcast %cst_86 : f32 to vector<8x8xf32>
    %215 = arith.cmpf olt, %199, %214 : vector<8x8xf32>
    %216 = arith.extui %215 : vector<8x8xi1> to vector<8x8xi32>
    %217 = arith.sitofp %216 : vector<8x8xi32> to vector<8x8xf32>
    %218 = arith.addf %213, %217 : vector<8x8xf32>
    %cst_87 = arith.constant 2.500000e-01 : f32
    %219 = vector.broadcast %cst_87 : f32 to vector<8x8xf32>
    %220 = arith.mulf %219, %218 : vector<8x8xf32>
    %cst_88 = arith.constant dense<0.000000e+00> : vector<8xf32>
    %221 = vector.multi_reduction <add>, %197, %cst_88 [1] : vector<8x8xf32> to vector<8xf32>
    %222 = vector.shape_cast %221 : vector<8xf32> to vector<8x1xf32>
    %cst_89 = arith.constant 1.000000e-10 : f32
    %223 = vector.broadcast %cst_89 : f32 to vector<8x1xf32>
    %224 = arith.addf %223, %222 : vector<8x1xf32>
    %cst_90 = arith.constant 1.000000e+00 : f32
    %225 = vector.broadcast %cst_90 : f32 to vector<8x1xf32>
    %226 = arith.divf %225, %224 : vector<8x1xf32>
    %227 = arith.mulf %197, %220 : vector<8x8xf32>
    %cst_91 = arith.constant dense<0.000000e+00> : vector<8xf32>
    %228 = vector.multi_reduction <add>, %227, %cst_91 [1] : vector<8x8xf32> to vector<8xf32>
    %229 = vector.shape_cast %228 : vector<8xf32> to vector<8x1xf32>
    %cst_92 = arith.constant 1.000000e-10 : f32
    %230 = vector.broadcast %cst_92 : f32 to vector<8x1xf32>
    %231 = arith.addf %230, %229 : vector<8x1xf32>
    %232 = arith.mulf %226, %231 : vector<8x1xf32>
    %cst_93 = arith.constant 5.000000e+01 : f32
    %233 = vector.broadcast %cst_93 : f32 to vector<8x1xf32>
    %234 = arith.mulf %232, %233 : vector<8x1xf32>
    %235 = math.floor %234 : vector<8x1xf32>
    %cst_94 = arith.constant 4.900000e+01 : f32
    %236 = vector.broadcast %cst_94 : f32 to vector<8x1xf32>
    %237 = arith.minimumf %235, %236 : vector<8x1xf32>
    %238 = arith.fptosi %237 : vector<8x1xf32> to vector<8x1xi32>
    %cst_95 = arith.constant dense<0xFF800000> : vector<8xf32>
    %239 = vector.multi_reduction <maximumf>, %146, %cst_95 [1] : vector<8x50xf32> to vector<8xf32>
    %240 = vector.shape_cast %239 : vector<8xf32> to vector<8x1xf32>
    %241 = vector.broadcast %240 : vector<8x1xf32> to vector<8x50xf32>
    %242 = arith.subf %146, %241 : vector<8x50xf32>
    %243 = math.exp %242 : vector<8x50xf32>
    %cst_96 = arith.constant dense<0.000000e+00> : vector<8xf32>
    %244 = vector.multi_reduction <add>, %243, %cst_96 [1] : vector<8x50xf32> to vector<8xf32>
    %245 = vector.shape_cast %244 : vector<8xf32> to vector<8x1xf32>
    %246 = math.log %245 : vector<8x1xf32>
    %247 = arith.addf %240, %246 : vector<8x1xf32>
    %248 = tpu.iota {dimensions = array<i32: 1>} : vector<8x50xi32>
    %249 = vector.broadcast %238 : vector<8x1xi32> to vector<8x50xi32>
    %250 = arith.cmpi eq, %248, %249 : vector<8x50xi32>
    %cst_97 = arith.constant 0.000000e+00 : f32
    %251 = vector.broadcast %cst_97 : f32 to vector<8x50xf32>
    %252 = arith.select %250, %146, %251 : vector<8x50xi1>, vector<8x50xf32>
    %cst_98 = arith.constant dense<0.000000e+00> : vector<8xf32>
    %253 = vector.multi_reduction <add>, %252, %cst_98 [1] : vector<8x50xf32> to vector<8xf32>
    %254 = vector.shape_cast %253 : vector<8xf32> to vector<8x1xf32>
    %255 = tpu.iota {dimensions = array<i32: 0>} : vector<8x1xi32>
    %256 = vector.broadcast %4 : i32 to vector<8x1xi32>
    %257 = arith.addi %256, %255 : vector<8x1xi32>
    %c8_i32_99 = arith.constant 8 : i32
    %258 = vector.broadcast %c8_i32_99 : i32 to vector<8x1xi32>
    %259 = arith.cmpi slt, %257, %258 : vector<8x1xi32>
    %260 = arith.subf %247, %254 : vector<8x1xf32>
    %cst_100 = arith.constant 0.000000e+00 : f32
    %261 = vector.broadcast %cst_100 : f32 to vector<8x1xf32>
    %262 = arith.select %259, %260, %261 : vector<8x1xi1>, vector<8x1xf32>
    %263 = vector.shape_cast %262 : vector<8x1xf32> to vector<1x8x1xf32>
    %cst_101 = arith.constant dense<0.000000e+00> : vector<1xf32>
    %264 = vector.multi_reduction <add>, %263, %cst_101 [1, 2] : vector<1x8x1xf32> to vector<1xf32>
    %265 = vector.shape_cast %264 : vector<1xf32> to vector<1x1x1xf32>
    %266 = vector.extract %265[0, 0, 0] : f32 from vector<1x1x1xf32>
    %267 = vector.broadcast %266 : f32 to vector<8x128xf32>
    %c0_102 = arith.constant 0 : index
    %c0_103 = arith.constant 0 : index
    %c0_104 = arith.constant 0 : index
    %c0_105 = arith.constant 0 : index
    %268 = vector.load %arg16[%c0_102, %c0_103, %c0_104, %c0_105] : memref<1x1x8x128xf32, #tpu.memory_space<vmem>>, vector<1x1x8x128xf32>
    %269 = vector.shape_cast %268 : vector<1x1x8x128xf32> to vector<8x128xf32>
    %270 = vector.shape_cast %267 : vector<8x128xf32> to vector<1x1x8x128xf32>
    tpu.vector_store %arg16[%c0_102, %c0_103, %c0_104, %c0_105], %270 {strides = array<i32>} : memref<1x1x8x128xf32, #tpu.memory_space<vmem>>, vector<1x1x8x128xf32>,
    %c0_i32 = arith.constant 0 : i32
    %271 = arith.cmpi eq, %arg1, %c0_i32 : i32
    %272 = arith.extui %271 : i1 to i32
    %c0_i32_106 = arith.constant 0 : i32
    %273 = arith.cmpi ne, %272, %c0_i32_106 : i32
    scf.if %273 {
      %c0_108 = arith.constant 0 : index
      %c0_109 = arith.constant 0 : index
      %c0_110 = arith.constant 0 : index
      %277 = vector.load %arg9[%c0_108, %c0_109, %c0_110] : memref<1x3x6xf32, #tpu.memory_space<vmem>>, vector<1x3x6xf32>
      %278 = vector.shape_cast %277 : vector<1x3x6xf32> to vector<3x6xf32>
      %c0_111 = arith.constant 0 : index
      %c0_112 = arith.constant 0 : index
      %c0_113 = arith.constant 0 : index
      %279 = vector.load %arg10[%c0_111, %c0_112, %c0_113] : memref<1x3x6xf32, #tpu.memory_space<vmem>>, vector<1x3x6xf32>
      %280 = vector.shape_cast %279 : vector<1x3x6xf32> to vector<3x6xf32>
      %c0_114 = arith.constant 0 : index
      %c0_115 = arith.constant 0 : index
      %c0_116 = arith.constant 0 : index
      %281 = vector.load %arg11[%c0_114, %c0_115, %c0_116] : memref<1x3x6xf32, #tpu.memory_space<vmem>>, vector<1x3x6xf32>
      %282 = vector.shape_cast %281 : vector<1x3x6xf32> to vector<3x6xf32>
      %c0_117 = arith.constant 0 : index
      %c0_118 = arith.constant 0 : index
      %c0_119 = arith.constant 0 : index
      %283 = vector.load %arg12[%c0_117, %c0_118, %c0_119] : memref<1x3x6xf32, #tpu.memory_space<vmem>>, vector<1x3x6xf32>
      %284 = vector.shape_cast %283 : vector<1x3x6xf32> to vector<3x6xf32>
      %c0_120 = arith.constant 0 : index
      %c0_121 = arith.constant 0 : index
      %285 = vector.load %arg13[%c0_120, %c0_121] : memref<1x6xf32, #tpu.memory_space<vmem>>, vector<1x6xf32>
      %286 = arith.subf %280, %282 : vector<3x6xf32>
      %287 = arith.mulf %286, %286 : vector<3x6xf32>
      %cst_122 = arith.constant dense<0.000000e+00> : vector<6xf32>
      %288 = vector.multi_reduction <add>, %287, %cst_122 [0] : vector<3x6xf32> to vector<6xf32>
      %289 = vector.shape_cast %288 : vector<6xf32> to vector<1x6xf32>
      %cst_123 = arith.constant 9.99999997E-7 : f32
      %290 = vector.broadcast %cst_123 : f32 to vector<1x6xf32>
      %291 = arith.addf %290, %289 : vector<1x6xf32>
      %292 = math.sqrt %291 : vector<1x6xf32>
      %293 = arith.subf %278, %280 : vector<3x6xf32>
      %294 = arith.mulf %293, %293 : vector<3x6xf32>
      %cst_124 = arith.constant dense<0.000000e+00> : vector<6xf32>
      %295 = vector.multi_reduction <add>, %294, %cst_124 [0] : vector<3x6xf32> to vector<6xf32>
      %296 = vector.shape_cast %295 : vector<6xf32> to vector<1x6xf32>
      %cst_125 = arith.constant 9.99999997E-7 : f32
      %297 = vector.broadcast %cst_125 : f32 to vector<1x6xf32>
      %298 = arith.addf %297, %296 : vector<1x6xf32>
      %299 = math.sqrt %298 : vector<1x6xf32>
      %300 = arith.subf %282, %284 : vector<3x6xf32>
      %301 = arith.mulf %300, %300 : vector<3x6xf32>
      %cst_126 = arith.constant dense<0.000000e+00> : vector<6xf32>
      %302 = vector.multi_reduction <add>, %301, %cst_126 [0] : vector<3x6xf32> to vector<6xf32>
      %303 = vector.shape_cast %302 : vector<6xf32> to vector<1x6xf32>
      %cst_127 = arith.constant 9.99999997E-7 : f32
      %304 = vector.broadcast %cst_127 : f32 to vector<1x6xf32>
      %305 = arith.addf %304, %303 : vector<1x6xf32>
      %306 = math.sqrt %305 : vector<1x6xf32>
      %307 = arith.subf %278, %280 : vector<3x6xf32>
      %308 = vector.broadcast %299 : vector<1x6xf32> to vector<3x6xf32>
      %309 = arith.divf %307, %308 : vector<3x6xf32>
      %310 = arith.subf %282, %280 : vector<3x6xf32>
      %311 = vector.broadcast %292 : vector<1x6xf32> to vector<3x6xf32>
      %312 = arith.divf %310, %311 : vector<3x6xf32>
      %313 = arith.subf %284, %282 : vector<3x6xf32>
      %314 = vector.broadcast %306 : vector<1x6xf32> to vector<3x6xf32>
      %315 = arith.divf %313, %314 : vector<3x6xf32>
      %cst_128 = arith.constant 1.329000e+00 : f32
      %316 = vector.broadcast %cst_128 : f32 to vector<1x6xf32>
      %317 = arith.subf %292, %316 : vector<1x6xf32>
      %318 = arith.mulf %317, %317 : vector<1x6xf32>
      %cst_129 = arith.constant 9.99999997E-7 : f32
      %319 = vector.broadcast %cst_129 : f32 to vector<1x6xf32>
      %320 = arith.addf %319, %318 : vector<1x6xf32>
      %321 = math.sqrt %320 : vector<1x6xf32>
      %cst_130 = arith.constant 1.680000e-01 : f32
      %322 = vector.broadcast %cst_130 : f32 to vector<1x6xf32>
      %323 = arith.subf %321, %322 : vector<1x6xf32>
      %cst_131 = arith.constant 0.000000e+00 : f32
      %324 = vector.broadcast %cst_131 : f32 to vector<1x6xf32>
      %325 = arith.maximumf %323, %324 : vector<1x6xf32>
      %326 = arith.mulf %309, %312 : vector<3x6xf32>
      %cst_132 = arith.constant dense<0.000000e+00> : vector<6xf32>
      %327 = vector.multi_reduction <add>, %326, %cst_132 [0] : vector<3x6xf32> to vector<6xf32>
      %328 = vector.shape_cast %327 : vector<6xf32> to vector<1x6xf32>
      %cst_133 = arith.constant 4.473000e-01 : f32
      %329 = vector.broadcast %cst_133 : f32 to vector<1x6xf32>
      %330 = arith.addf %328, %329 : vector<1x6xf32>
      %331 = arith.mulf %330, %330 : vector<1x6xf32>
      %cst_134 = arith.constant 9.99999997E-7 : f32
      %332 = vector.broadcast %cst_134 : f32 to vector<1x6xf32>
      %333 = arith.addf %332, %331 : vector<1x6xf32>
      %334 = math.sqrt %333 : vector<1x6xf32>
      %cst_135 = arith.constant 1.680000e-01 : f32
      %335 = vector.broadcast %cst_135 : f32 to vector<1x6xf32>
      %336 = arith.subf %334, %335 : vector<1x6xf32>
      %cst_136 = arith.constant 0.000000e+00 : f32
      %337 = vector.broadcast %cst_136 : f32 to vector<1x6xf32>
      %338 = arith.maximumf %336, %337 : vector<1x6xf32>
      %cst_137 = arith.constant 0.000000e+00 : f32
      %339 = vector.broadcast %cst_137 : f32 to vector<3x6xf32>
      %340 = arith.subf %339, %312 : vector<3x6xf32>
      %341 = arith.mulf %340, %315 : vector<3x6xf32>
      %cst_138 = arith.constant dense<0.000000e+00> : vector<6xf32>
      %342 = vector.multi_reduction <add>, %341, %cst_138 [0] : vector<3x6xf32> to vector<6xf32>
      %343 = vector.shape_cast %342 : vector<6xf32> to vector<1x6xf32>
      %cst_139 = arith.constant 5.203000e-01 : f32
      %344 = vector.broadcast %cst_139 : f32 to vector<1x6xf32>
      %345 = arith.addf %343, %344 : vector<1x6xf32>
      %346 = arith.mulf %345, %345 : vector<1x6xf32>
      %cst_140 = arith.constant 9.99999997E-7 : f32
      %347 = vector.broadcast %cst_140 : f32 to vector<1x6xf32>
      %348 = arith.addf %347, %346 : vector<1x6xf32>
      %349 = math.sqrt %348 : vector<1x6xf32>
      %cst_141 = arith.constant 3.600000e-01 : f32
      %350 = vector.broadcast %cst_141 : f32 to vector<1x6xf32>
      %351 = arith.subf %349, %350 : vector<1x6xf32>
      %cst_142 = arith.constant 0.000000e+00 : f32
      %352 = vector.broadcast %cst_142 : f32 to vector<1x6xf32>
      %353 = arith.maximumf %351, %352 : vector<1x6xf32>
      %354 = arith.addf %325, %338 : vector<1x6xf32>
      %355 = arith.addf %354, %353 : vector<1x6xf32>
      %356 = arith.mulf %355, %285 : vector<1x6xf32>
      %357 = vector.shape_cast %356 : vector<1x6xf32> to vector<1x1x6xf32>
      %cst_143 = arith.constant dense<0.000000e+00> : vector<1xf32>
      %358 = vector.multi_reduction <add>, %357, %cst_143 [1, 2] : vector<1x1x6xf32> to vector<1xf32>
      %359 = vector.shape_cast %358 : vector<1xf32> to vector<1x1x1xf32>
      %360 = vector.extract %359[0, 0, 0] : f32 from vector<1x1x1xf32>
      %361 = vector.broadcast %360 : f32 to vector<8x128xf32>
      %c0_144 = arith.constant 0 : index
      %c0_145 = arith.constant 0 : index
      %c0_146 = arith.constant 0 : index
      %c0_147 = arith.constant 0 : index
      %362 = vector.load %arg17[%c0_144, %c0_145, %c0_146, %c0_147] : memref<1x1x8x128xf32, #tpu.memory_space<vmem>>, vector<1x1x8x128xf32>
      %363 = vector.shape_cast %362 : vector<1x1x8x128xf32> to vector<8x128xf32>
      %364 = vector.shape_cast %361 : vector<8x128xf32> to vector<1x1x8x128xf32>
      tpu.vector_store %arg17[%c0_144, %c0_145, %c0_146, %c0_147], %364 {strides = array<i32>} : memref<1x1x8x128xf32, #tpu.memory_space<vmem>>, vector<1x1x8x128xf32>,
    } else {
    }
    %true = arith.constant true
    %274 = arith.xori %271, %true : i1
    %275 = arith.extui %274 : i1 to i32
    %c0_i32_107 = arith.constant 0 : i32
    %276 = arith.cmpi ne, %275, %c0_i32_107 : i32
    scf.if %276 {
      %cst_108 = arith.constant 0.000000e+00 : f32
      %277 = vector.broadcast %cst_108 : f32 to vector<8x128xf32>
      %c0_109 = arith.constant 0 : index
      %c0_110 = arith.constant 0 : index
      %c0_111 = arith.constant 0 : index
      %c0_112 = arith.constant 0 : index
      %278 = vector.load %arg17[%c0_109, %c0_110, %c0_111, %c0_112] : memref<1x1x8x128xf32, #tpu.memory_space<vmem>>, vector<1x1x8x128xf32>
      %279 = vector.shape_cast %278 : vector<1x1x8x128xf32> to vector<8x128xf32>
      %280 = vector.shape_cast %277 : vector<8x128xf32> to vector<1x1x8x128xf32>
      tpu.vector_store %arg17[%c0_109, %c0_110, %c0_111, %c0_112], %280 {strides = array<i32>} : memref<1x1x8x128xf32, #tpu.memory_space<vmem>>, vector<1x1x8x128xf32>,
    } else {
    }
    return
  }
  func.func @transform_0(%arg0: i32, %arg1: i32) -> (i32, i32, i32, i32) {
    %c0_i32 = arith.constant 0 : i32
    %c0_i32_0 = arith.constant 0 : i32
    %c0_i32_1 = arith.constant 0 : i32
    return %arg0, %c0_i32, %arg1, %c0_i32_0 : i32, i32, i32, i32
  }
  func.func @transform_1(%arg0: i32, %arg1: i32) -> (i32, i32, i32, i32) {
    %c0_i32 = arith.constant 0 : i32
    %c0_i32_0 = arith.constant 0 : i32
    %c0_i32_1 = arith.constant 0 : i32
    %c0_i32_2 = arith.constant 0 : i32
    return %arg0, %c0_i32, %c0_i32_0, %c0_i32_1 : i32, i32, i32, i32
  }
  func.func @transform_2(%arg0: i32, %arg1: i32) -> (i32, i32, i32) {
    %c0_i32 = arith.constant 0 : i32
    %c0_i32_0 = arith.constant 0 : i32
    return %arg0, %arg1, %c0_i32 : i32, i32, i32
  }
  func.func @transform_3(%arg0: i32, %arg1: i32) -> (i32, i32, i32) {
    %c0_i32 = arith.constant 0 : i32
    %c0_i32_0 = arith.constant 0 : i32
    return %arg0, %arg1, %c0_i32 : i32, i32, i32
  }
  func.func @transform_4(%arg0: i32, %arg1: i32) -> (i32, i32, i32) {
    %c0_i32 = arith.constant 0 : i32
    %c0_i32_0 = arith.constant 0 : i32
    return %arg0, %arg1, %c0_i32 : i32, i32, i32
  }
  func.func @transform_5(%arg0: i32, %arg1: i32) -> (i32, i32, i32) {
    %c0_i32 = arith.constant 0 : i32
    %c0_i32_0 = arith.constant 0 : i32
    %c0_i32_1 = arith.constant 0 : i32
    return %arg0, %c0_i32, %c0_i32_0 : i32, i32, i32
  }
  func.func @transform_6(%arg0: i32, %arg1: i32) -> (i32, i32, i32) {
    %c0_i32 = arith.constant 0 : i32
    %c0_i32_0 = arith.constant 0 : i32
    %c0_i32_1 = arith.constant 0 : i32
    return %arg0, %c0_i32, %c0_i32_0 : i32, i32, i32
  }
  func.func @transform_7(%arg0: i32, %arg1: i32) -> (i32, i32, i32) {
    %c0_i32 = arith.constant 0 : i32
    %c0_i32_0 = arith.constant 0 : i32
    %c0_i32_1 = arith.constant 0 : i32
    return %arg0, %c0_i32, %c0_i32_0 : i32, i32, i32
  }
  func.func @transform_8(%arg0: i32, %arg1: i32) -> (i32, i32, i32) {
    %c0_i32 = arith.constant 0 : i32
    %c0_i32_0 = arith.constant 0 : i32
    %c0_i32_1 = arith.constant 0 : i32
    return %arg0, %c0_i32, %c0_i32_0 : i32, i32, i32
  }
  func.func @transform_9(%arg0: i32, %arg1: i32) -> (i32, i32, i32) {
    %c0_i32 = arith.constant 0 : i32
    %c0_i32_0 = arith.constant 0 : i32
    %c0_i32_1 = arith.constant 0 : i32
    return %arg0, %c0_i32, %c0_i32_0 : i32, i32, i32
  }
  func.func @transform_10(%arg0: i32, %arg1: i32) -> (i32, i32, i32) {
    %c0_i32 = arith.constant 0 : i32
    %c0_i32_0 = arith.constant 0 : i32
    %c0_i32_1 = arith.constant 0 : i32
    return %arg0, %c0_i32, %c0_i32_0 : i32, i32, i32
  }
  func.func @transform_11(%arg0: i32, %arg1: i32) -> (i32, i32) {
    %c0_i32 = arith.constant 0 : i32
    %c0_i32_0 = arith.constant 0 : i32
    %c0_i32_1 = arith.constant 0 : i32
    return %c0_i32, %c0_i32_0 : i32, i32
  }
  func.func @transform_12(%arg0: i32, %arg1: i32) -> (i32, i32, i32, i32) {
    %c0_i32 = arith.constant 0 : i32
    %c0_i32_0 = arith.constant 0 : i32
    %c0_i32_1 = arith.constant 0 : i32
    return %arg0, %arg1, %c0_i32, %c0_i32_0 : i32, i32, i32, i32
  }
  func.func @transform_13(%arg0: i32, %arg1: i32) -> (i32, i32, i32, i32) {
    %c0_i32 = arith.constant 0 : i32
    %c0_i32_0 = arith.constant 0 : i32
    %c0_i32_1 = arith.constant 0 : i32
    return %arg0, %arg1, %c0_i32, %c0_i32_0 : i32, i32, i32, i32
  }
  func.func @transform_14(%arg0: i32, %arg1: i32) -> (i32, i32, i32, i32) {
    %c0_i32 = arith.constant 0 : i32
    %c0_i32_0 = arith.constant 0 : i32
    %c0_i32_1 = arith.constant 0 : i32
    return %arg0, %arg1, %c0_i32, %c0_i32_0 : i32, i32, i32, i32
  }
  func.func @transform_15(%arg0: i32, %arg1: i32) -> (i32, i32, i32, i32) {
    %c0_i32 = arith.constant 0 : i32
    %c0_i32_0 = arith.constant 0 : i32
    %c0_i32_1 = arith.constant 0 : i32
    return %arg0, %arg1, %c0_i32, %c0_i32_0 : i32, i32, i32, i32
  }
}

</mosaic_0001>

<bundles_post_ra>
// kernel: tpu_custom_call.1
= control target key start
LH: loop header
LB: loop body
LE: loop exit
PB: predicated region body
PF: predicated region fallthrough
CT: control target
= control target key end

     0   :  { %s3291_s0 = inlined_call_operand.vmem [shape: f32[2,3,8,7], index: 0, kind: input, shape index: {}]   ;;  %s3292_s1 = inlined_call_operand.vmem [shape: f32[2,3,7,8], index: 1, kind: input, shape index: {}]   ;;  %s3293_s2 = inlined_call_operand.vmem [shape: f32[2,8,50], index: 2, kind: input, shape index: {}]   ;;  %s3294_s3 = inlined_call_operand.vmem [shape: f32[2,8,3], index: 3, kind: input, shape index: {}]   ;;  %s3295_s4 = inlined_call_operand.vmem [shape: f32[2,8,3], index: 4, kind: input, shape index: {}]   ;;  %s3296_s5 = inlined_call_operand.vmem [shape: f32[2,3,8], index: 5, kind: input, shape index: {}]   ;;  %s3297_s6 = inlined_call_operand.vmem [shape: f32[2,3,8], index: 6, kind: input, shape index: {}]   ;;  %s3298_s7 = inlined_call_operand.vmem [shape: f32[2,3,6], index: 7, kind: input, shape index: {}]   ;;  %s3299_s8 = inlined_call_operand.vmem [shape: f32[2,3,6], index: 8, kind: input, shape index: {}]   ;;  %s3300_s9 = inlined_call_operand.vmem [shape: f32[2,3,6], index: 9, kind: input, shape index: {}]   ;;  %s3301_s10 = inlined_call_operand.vmem [shape: f32[2,3,6], index: 10, kind: input, shape index: {}]   ;;  %s3302_s11 = inlined_call_operand.vmem [shape: f32[1,6], index: 11, kind: input, shape index: {}]   ;;  %s3303_s12 = inlined_call_operand.hbm [shape: f32[2,1,8,128], index: 12, kind: output, shape index: {0}]   ;;  %s3304_s13 = inlined_call_operand.hbm [shape: f32[2,1,8,128], index: 13, kind: output, shape index: {1}]   ;;  %s3305_s14 = inlined_call_operand.hbm [shape: f32[2,1,8,128], index: 14, kind: output, shape index: {2}]   ;;  %s3306_s15 = inlined_call_operand.hbm [shape: f32[2,1,8,128], index: 15, kind: output, shape index: {3}]  }
   0x1   :  { %3311 = sst [smem:[#allocation15_spill]] %s3291_s0 }
   0x2   :  { %3312 = sst [smem:[#allocation16_spill]] %s3292_s1 }
   0x3   :  { %3313 = sst [smem:[#allocation17_spill]] %s3293_s2 }
   0x4   :  { %3314 = sst [smem:[#allocation18_spill]] %s3294_s3 }
   0x5   :  { %3315 = sst [smem:[#allocation19_spill]] %s3295_s4 }
   0x6   :  { %3316 = sst [smem:[#allocation20_spill]] %s3296_s5 }
   0x7   :  { %3317 = sst [smem:[#allocation21_spill]] %s3297_s6 }
   0x8   :  { %3318 = sst [smem:[#allocation22_spill]] %s3298_s7 }
   0x9   :  { %3319 = sst [smem:[#allocation23_spill]] %s3299_s8 }
   0xa   :  { %21 = vsyncpa [#allocation3], 0 }
   0xb   :  { %23 = vsyncpa [#allocation3 + $0x1], 0 }
   0xc   :  { %24 = vsyncpa [#allocation5], 0 }
   0xd   :  { %26 = vsyncpa [#allocation5 + $0x1], 0 }
   0xe   :  { %27 = vsyncpa [#allocation8], 0 }
   0xf   :  { %29 = vsyncpa [#allocation8 + $0x1], 0  ;;  %s2868_s18 = smov 0   ;;  %s2870_s19 = smov 0  }
  0x10   :  { %s2872_s20 = smov 0   ;;  %s2874_s21 = smov 0  }
  0x11   :  { %s2876_s22 = smov 0   ;;  %s2878_s23 = smov 0  }
  0x12 LB: > { %3320 = sst [smem:[#allocation12_spill]] %s2775_s22  ;;  %s3308_s24 = sadd.s32 4294967295, %s2779_s23   ;;  %s2779_s23 = sphi %s2878_s23, %s35_s23   ;;  %s2775_s22 = sphi %s2876_s22, %s3342_s22   ;;  %s2771_s21 = sphi %s2874_s21, %s3346_s21   ;;  %s2767_s20 = sphi %s2872_s20, %s3345_s20   ;;  %s2763_s19 = sphi %s2870_s19, %s3344_s19   ;;  %s2759_s18 = sphi %s2868_s18, %s3343_s18  }
  0x13   : > { %s3307_s25 = sadd.s32 4294967294, %s2779_s23   ;;  %s47_s26 = sadd.s32 1, %s2775_s22 }
  0x14   : > { %s371_s27 = sadd.s32 1, %s2767_s20  ;;  %p49_p0 = scmp.ge.s32.totalorder %s47_s26, 2 }
  0x15   : > { %p381_p1 = scmp.ne.s32.totalorder %s2767_s20, %s2763_s19  ;;  %p382_p2 = scmp.eq.s32.totalorder %s3308_s24, 1 }
  0x16   : > { %p387_p3 = scmp.ne.s32.totalorder %s2763_s19, %s2759_s18  ;;  %s3348_s26 = smov (%p49_p0, %s47_s26), 0 }
  0x17   : > { %3321 = sst [smem:[#allocation13_spill]] %s3348_s26  ;;  %p2910_p4 = por %p382_p2, %p381_p1 }
  0x18   : > { %p388_p5 = scmp.eq.s32.totalorder %s3307_s25, 1  ;;  %s366_s29 = ssub.s32 %s2775_s22, %s3348_s26 }
  0x19   : > { %p2350_p6 = scmp.ge.s32.totalorder %s2779_s23, 1  ;;  %p369_p7 = scmp.eq.s32.totalorder %s366_s29, 0 }
  0x1a   : > { %p2919_p8 = por %p388_p5, %p387_p3  ;;  %p584_p9 = scmp.lt.s32.totalorder %s2779_s23, 3 }
  0x1b   : > { %s2925_s16 = scalar_select %p369_p7, %s2767_s20, %s371_s27  }
  0x1c   : > { %p585_p10 = pnand %p2350_p6, %p584_p9 }
  0x1d   : > { %3324 = sst [smem:[#allocation14_spill]] %s2925_s16  ;;  %p700_p11 = scmp.lt.s32.totalorder (!%p585_p10), %s2771_s21, 1  ;;  %v2781_v0 = vmov (!%p585_p10), 0.0   ;;  %vm2782_vm0 = vmmov (!%p585_p10), 0   ;;  %vm782_vm1 = vcmask (!%p585_p10), 1046528   ;;  %vm778_vm2 = vcmask (!%p585_p10), 56320  }
  0x1e   : > { %588 = sbr.rel (%p585_p10) target bundleno = 863 (0x35f), region = 68  ;;  %2428 = vmatprep.subr.mxu0 (!%p585_p10), %v2781_v0  ;;  %2433 = vmatprep.subr.mxu1 (!%p585_p10), %v2781_v0  ;;  %s3325_s1 = sld [smem:[#allocation16_spill]] (!%p585_p10)  ;;  %vm1562_vm3 = vcmask (!%p585_p10), 1042432   ;;  %vm1558_vm4 = vcmask (!%p585_p10), 23552   ;;  %vm1799_vm5 = vcmask (!%p585_p10), 408576   ;;  %vm1641_vm6 = vcmask (!%p585_p10), 59392  }
  0x1f   : > { %2430 = vmatprep.mubr.msk.f32.mxu0 (!%p585_p10), %vm2782_vm0, %v2781_v0  ;;  %2435 = vmatprep.mubr.msk.f32.mxu1 (!%p585_p10), %vm2782_vm0, %v2781_v0  ;;  %s3326_s0 = sld [smem:[#allocation15_spill]] (!%p585_p10)  ;;  %s3327_s4 = sld [smem:[#allocation19_spill]] (!%p585_p10)  ;;  %v765_v62 = vlaneseq (!%p585_p10)  ;;  %vm1018_vm12 = vcmask (!%p585_p10), 64512  }
  0x20   : > { %s3328_s6 = sld [smem:[#allocation21_spill]] (!%p585_p10)  ;;  %s3329_s2 = sld [smem:[#allocation17_spill]] (!%p585_p10) }
  0x21   : > { %s3330_s3 = sld [smem:[#allocation18_spill]] (!%p585_p10)  ;;  %s3331_s5 = sld [smem:[#allocation20_spill]] (!%p585_p10) }
  0x22   : > { %s3336_s8 = sld [smem:[#allocation23_spill]] (!%p585_p10)  ;;  %s3337_s7 = sld [smem:[#allocation22_spill]] (!%p585_p10) }
  0x25   : > { %s2931_s17 = scalar_select %p700_p11, %s2771_s21, 1 }
  0x27   : > { %s2483_s27 = smul.u32 24, %s2931_s17  ;;  %s2959_s22 = sshll.u32 %s2931_s17, 3 }
  0x28   : > { %s2967_s25 = sshll.u32 %s2931_s17, 2  ;;  %s726_s17 = scalar_lea.vmem %s3330_s3, %s2959_s22 }
  0x29   : > { %s712_s24 = scalar_lea.vmem %s3325_s1, %s2483_s27  ;;  %s707_s16 = scalar_lea.vmem %s3326_s0, %s2483_s27  ;;  %v1554_v11 = vld [vmem:[%s726_s17] sm:$0xff] }
  0x2a   : > { %v761_v1 = vld [vmem:[%s712_s24] sm:$0x7f]  ;;  %v759_v3 = vld [vmem:[%s707_s16 + $0x8] sm:$0xff]  ;;  %v760_v5 = vld [vmem:[%s707_s16 + $0x10] sm:$0xff]  ;;  %s733_s27 = scalar_lea.vmem %s3327_s4, %s2959_s22  ;;  %s741_s0 = scalar_lea.vmem %s3328_s6, %s2967_s25  ;;  %v1737_v14 = vmul.f32 %v1554_v11, %v1554_v11 }
  0x2b   : > { %v758_v2 = vld [vmem:[%s707_s16] sm:$0xff]  ;;  %2429 = vmatpush3.msk.msra.mxu0 %vm782_vm1, %v761_v1  ;;  %2434 = vmatpush3.msk.msra.mxu1 %vm782_vm1, %v761_v1  ;;  %v762_v4 = vld [vmem:[%s712_s24 + $0x8] sm:$0x7f]  ;;  %v763_v6 = vld [vmem:[%s712_s24 + $0x10] sm:$0x7f]  ;;  %s719_s16 = scalar_lea.vmem %s3329_s2, %s2959_s22  ;;  %s737_s24 = scalar_lea.vmem %s3331_s5, %s2967_s25 }
  0x2c   : > { %2431 = vmatmul.mubr.msk.f32.vlgmr.msra.gmra.mrb[0].mxu0 %vm778_vm2, %v758_v2  ;;  %2436 = vmatmul.mubr.msk.f32.vlgmr.msra.gmra.mrb[0].mxu1 %vm778_vm2, %v759_v3  ;;  %v1555_v7 = vld [vmem:[%s733_s27] sm:$0xff]  ;;  %v1738_v16 = vsel %vm1558_vm4, %v1737_v14, 0.0  ;;  %s749_s4 = scalar_lea.vmem %s3336_s8, %s2967_s25  ;;  %s745_s29 = scalar_lea.vmem %s3337_s7, %s2967_s25 }
  0x2d   : > { %2438 = vmatprep.subr.mxu0 %v2781_v0  ;;  %2443 = vmatprep.subr.mxu1 %v2781_v0  ;;  %v1636_v8 = vmul.f32 %v1555_v7, %v1555_v7  ;;  %v1557_v9 = vld [vmem:[%s741_s0] sm:$0x7]  ;;  %s757_s3 = scalar_lea.vmem %s3301_s10, %s2967_s25  ;;  %s3136_s1 = sand.u32 1, %s2763_s19  }
  0x2e   : > { %2439 = vmatpush3.msk.msra.mxu0 %vm782_vm1, %v761_v1  ;;  %2440 = vmatprep.mubr.msk.f32.mxu0 %vm2782_vm0, %v2781_v0  ;;  %v3006_v10 = vld [vmem:[%s719_s16] sm:$0xff]  ;;  %v1640_v17 = vmul.f32 %v1557_v9, %v1557_v9  ;;  %s753_s16 = scalar_lea.vmem %s3300_s9, %s2967_s25  ;;  %s3139_s22 = sshll.u32 %s3136_s1, 3 }
  0x2f   : > { %2444 = vmatpush3.msk.msra.mxu1 %vm782_vm1, %v762_v4  ;;  %2445 = vmatprep.mubr.msk.f32.mxu1 %vm2782_vm0, %v2781_v0  ;;  %v1556_v12 = vld [vmem:[%s737_s24] sm:$0x7]  ;;  %v1637_v13 = vsel %vm1558_vm4, %v1636_v8, 0.0  ;;  %v1800_v15 = vsel %vm1799_vm5, %v3006_v10, -inf  ;;  %s678_s2 = scalar_lea.vmem [#allocation2], %s3139_s22  ;;  %s685_s5 = scalar_lea.vmem [#allocation4], %s3139_s22 }
  0x30   : > { %2441 = vmatmul.mubr.msk.f32.vlgmr.msra.gmra.mrb[2].mxu0 %vm778_vm2, %v760_v5  ;;  %2446 = vmatmul.mubr.msk.f32.vlgmr.msra.gmra.mrb[2].mxu1 %vm778_vm2, %v758_v2  ;;  %v1741_v18 = vmul.f32 %v1556_v12, %v1556_v12  ;;  %v1642_v19 = vsel %vm1641_vm6, %v1640_v17, 0.0  ;;  %v3027_v17 = vand.u32 127, %v765_v62  ;;  %s3338_s6 = sadd.s32 4294967295, %s2779_s23   ;;  %s3150_s8 = sshll.u32 %s2771_s21, 7 }
  0x31   : > { %2448 = vmatprep.subr.mxu0 %v2781_v0  ;;  %2453 = vmatprep.subr.mxu1 %v2781_v0  ;;  %v1643_v20 = vrot.slane %v1642_v19, 4  ;;  %s3147_s7 = sand.u32 1, %s3338_s6  }
  0x32   : > { %2449 = vmatpush3.msk.msra.mxu0 %vm782_vm1, %v762_v4  ;;  %2450 = vmatprep.mubr.msk.f32.mxu0 %vm2782_vm0, %v2781_v0  ;;  %v1742_v21 = vsel %vm1641_vm6, %v1741_v18, 0.0  ;;  %vm773_vm9 = vcmp.lt.s32.totalorder %v3027_v17, 4 }
  0x33   : > { %2454 = vmatpush3.msk.msra.mxu1 %vm782_vm1, %v762_v4  ;;  %2455 = vmatprep.mubr.msk.f32.mxu1 %vm2782_vm0, %v2781_v0  ;;  %v1644_v22 = vadd.f32 %v1643_v20, %v1642_v19  ;;  %v1743_v23 = vrot.slane %v1742_v21, 4 }
  0x34   : > { %2451 = vmatmul.mubr.msk.f32.vlgmr.msra.gmra.mrb[4].mxu0 %vm778_vm2, %v759_v3  ;;  %2456 = vmatmul.mubr.msk.f32.vlgmr.msra.gmra.mrb[4].mxu1 %vm778_vm2, %v760_v5 }
  0x35   : > { %2458 = vmatprep.subr.mxu0 %v2781_v0  ;;  %2463 = vmatprep.subr.mxu1 %v2781_v0  ;;  %v1645_v24 = vrot.slane %v1644_v22, 2  ;;  %v1744_v25 = vadd.f32 %v1743_v23, %v1742_v21 }
  0x36   : > { %2459 = vmatpush3.msk.msra.mxu0 %vm782_vm1, %v763_v6  ;;  %2460 = vmatprep.mubr.msk.f32.mxu0 %vm2782_vm0, %v2781_v0 }
  0x37   : > { %2464 = vmatpush3.msk.msra.mxu1 %vm782_vm1, %v763_v6  ;;  %2465 = vmatprep.mubr.msk.f32.mxu1 %vm2782_vm0, %v2781_v0  ;;  %v1646_v33 = vadd.f32 %v1645_v24, %v1644_v22  ;;  %v1745_v34 = vrot.slane %v1744_v25, 2 }
  0x38   : > { %2461 = vmatmul.mubr.msk.f32.vlgmr.msra.gmra.mrb[6].mxu0 %vm778_vm2, %v758_v2  ;;  %2466 = vmatmul.mubr.msk.f32.vlgmr.msra.gmra.mrb[6].mxu1 %vm778_vm2, %v759_v3 }
  0x39   : > { %2468 = vmatprep.subr.mxu0 %v2781_v0  ;;  %2473 = vmatprep.subr.mxu1 %v2781_v0  ;;  %v1647_v42 = vrot.slane %v1646_v33, 1  ;;  %v1746_v44 = vadd.f32 %v1745_v34, %v1744_v25 }
  0x3a   : > { %2469 = vmatpush3.msk.msra.mxu0 %vm782_vm1, %v763_v6  ;;  %2470 = vmatprep.mubr.msk.f32.mxu0 %vm2782_vm0, %v2781_v0 }
  0x3b   : > { %2474 = vmatpush3.msk.msra.mxu1 %vm1562_vm3, %v1557_v9  ;;  %2475 = vmatprep.mubr.msk.f32.mxu1 %vm2782_vm0, %v2781_v0  ;;  %v1648_v53 = vadd.f32 %v1647_v42, %v1646_v33  ;;  %v1747_v54 = vrot.slane %v1746_v44, 1 }
  0x3c   : > { %2471 = vmatmul.mubr.msk.f32.vlgmr.msra.gmra.mrb[8].mxu0 %vm778_vm2, %v760_v5  ;;  %2476 = vmatmul.mubr.msk.f32.vlgmr.msra.gmra.mrb[8].mxu1 %vm1558_vm4, %v1555_v7 }
  0x3d   : > { %2478 = vmatprep.subr.mxu0 %v2781_v0  ;;  %2480 = vmatprep.mubr.msk.f32.mxu0 %vm2782_vm0, %v2781_v0  ;;  %v1748_v3 = vadd.f32 %v1747_v54, %v1746_v44 }
  0x3e   : > { %2479 = vmatpush3.msk.msra.mxu0 %vm1562_vm3, %v1556_v12  ;;  %1638 = vadd.xlane.f32.xlu0 %v1637_v13  ;;  %v3025_v12 = vshrl.u32 %v765_v62, 7 }
  0x3f   : > { %1801 = vmax.xlane.f32.xlu1 %v1800_v15 }
  0x40   : > { %2481 = vmatmul.mubr.msk.f32.vlgmr.msra.gmra.mrb[10].mxu0 %vm1558_vm4, %v1554_v11  ;;  %vm772_vm7 = vcmp.lt.s32.totalorder %v3025_v12, 4  ;;  %vm1762_vm3 = vcmp.ne.s32.totalorder %v3025_v12, %v3027_v17 }
  0x41   : > { %vm3037_vm11 = vmxor %vm772_vm7, %vm773_vm9  ;;  %vm2783_vm9 = vmmov 1  }
  0x42   : > { %1739 = vadd.xlane.f32.xlu0 %v1738_v16 }
  0xcb   : > { %v1639_v43 = vpop.xlane.xlu0 %1638 }
  0xcc   : > { %v1649_v2 = vadd.f32 %v1648_v53, %v1639_v43  ;;  %v3029_v23 = vpop.xlane.xlu1 %1801 }
  0xcf   : > { %v1740_v4 = vpop.xlane.xlu0 %1739 }
  0xd0   : > { %v1749_v15 = vadd.f32 %v1748_v3, %v1740_v4 }
  0xff   : > { %v852_v26 = vpop.f32.mrb[0].mxu0  ;;  %v927_v27 = vpop.f32.mrb[0].mxu1 }
 0x100   : > { %v856_v28 = vmul.f32 %v852_v26, %v852_v26  ;;  %v2432_v29 = vpop.f32.mrb[1].mxu0  ;;  %v931_v30 = vmul.f32 %v927_v27, %v927_v27  ;;  %v2437_v31 = vpop.f32.mrb[1].mxu1  ;;  %v1803_v27 = vsub.f32 %v3006_v10, %v3029_v23 }
 0x102   : > { %v932_v32 = vadd.f32 %v931_v30, %v856_v28 }
 0x103   : > { %v1002_v35 = vpop.f32.mrb[2].mxu0  ;;  %v1112_v36 = vpop.f32.mrb[2].mxu1 }
 0x104   : > { %v1006_v37 = vmul.f32 %v1002_v35, %v1002_v35  ;;  %v2442_v38 = vpop.f32.mrb[3].mxu0  ;;  %v2447_v39 = vpop.f32.mrb[3].mxu1  ;;  %v1116_v41 = vmul.f32 %v1112_v36, %v1112_v36  ;;  %v1804_v36 = vmul.f32 1.442695, %v1803_v27 }
 0x106   : > { %v1007_v40 = vadd.f32 %v1006_v37, %v932_v32 }
 0x107   : > { %v1184_v45 = vpop.f32.mrb[4].mxu0  ;;  %v1256_v46 = vpop.f32.mrb[4].mxu1 }
 0x108   : > { %v1008_v47 = vadd.f32 0.0001, %v1007_v40  ;;  %v1188_v48 = vmul.f32 %v1184_v45, %v1184_v45  ;;  %v2452_v49 = vpop.f32.mrb[5].mxu0  ;;  %v1260_v50 = vmul.f32 %v1256_v46, %v1256_v46  ;;  %v2457_v51 = vpop.f32.mrb[5].mxu1 }
 0x10a   : > { %2575 = vrsqrt.f32 %v1008_v47  ;;  %v1189_v52 = vadd.f32 %v1188_v48, %v1116_v41  ;;  %vm1011_vm8 = vcmp.eq.f32.partialorder %v1008_v47, inf  ;;  %v1014_v29 = vand.u32 2147483648, %v1008_v47 }
 0x10b   : > { %v1365_v55 = vpop.f32.mrb[6].mxu0  ;;  %v1437_v56 = vpop.f32.mrb[6].mxu1  ;;  %vm1013_vm10 = vcmp.eq.f32.partialorder %v1008_v47, 0.0 }
 0x10c   : > { %v1261_v57 = vadd.f32 %v1260_v50, %v1189_v52  ;;  %v1369_v58 = vmul.f32 %v1365_v55, %v1365_v55  ;;  %v2462_v59 = vpop.f32.mrb[7].mxu0  ;;  %v1441_v60 = vmul.f32 %v1437_v56, %v1437_v56  ;;  %v2467_v61 = vpop.f32.mrb[7].mxu1 }
 0x10e   : > { %v1262_v63 = vadd.f32 0.0001, %v1261_v57  ;;  %v1442_v1 = vadd.f32 %v1441_v60, %v1369_v58 }
 0x10f   : > { %v1509_v5 = vpop.f32.mrb[8].mxu0  ;;  %v1632_v6 = vpop.f32.mrb[8].mxu1 }
 0x110   : > { %2577 = vrsqrt.f32 %v1262_v63  ;;  %v1513_v7 = vmul.f32 %v1509_v5, %v1509_v5  ;;  %v1650_v8 = vmul.f32 2.0, %v1632_v6  ;;  %v2472_v9 = vpop.f32.mrb[9].mxu0  ;;  %v2477_v11 = vpop.f32.mrb[9].mxu1  ;;  %vm1265_vm13 = vcmp.eq.f32.partialorder %v1262_v63, inf }
 0x111   : > { %v1268_v38 = vand.u32 2147483648, %v1262_v63  ;;  %vm1267_vm14 = vcmp.eq.f32.partialorder %v1262_v63, 0.0 }
 0x112   : > { %v1514_v13 = vadd.f32 %v1513_v7, %v1442_v1  ;;  %v1651_v14 = vsub.f32 %v1649_v2, %v1650_v8 }
 0x113   : > { %v1733_v16 = vpop.f32.mrb[10].mxu0 }
 0x114   : > { %v2576_v18 = vpop.eup %2575  ;;  %v1515_v19 = vadd.f32 0.0001, %v1514_v13  ;;  %v1652_v20 = vmax.f32 %v1651_v14, 0.0  ;;  %v1750_v21 = vmul.f32 2.0, %v1733_v16  ;;  %v2482_v22 = vpop.f32.mrb[11].mxu0 }
 0x115   : > { %v1010_v24 = vmul.f32 %v2576_v18, %v1008_v47 }
 0x116   : > { %2579 = vrsqrt.f32 %v1515_v19  ;;  %v1653_v25 = vadd.f32 1e-10, %v1652_v20  ;;  %v1751_v26 = vsub.f32 %v1749_v15, %v1750_v21  ;;  %vm1518_vm15 = vcmp.eq.f32.partialorder %v1515_v19, inf }
 0x117   : > { %v1012_v28 = vsel %vm1011_vm8, %v1008_v47, %v1010_v24  ;;  %v1521_v48 = vand.u32 2147483648, %v1515_v19  ;;  %vm1520_vm0 = vcmp.eq.f32.partialorder %v1515_v19, 0.0 }
 0x118   : > { %2581 = vrsqrt.f32 %v1653_v25  ;;  %v1752_v30 = vmax.f32 %v1751_v26, 0.0  ;;  %v1015_v31 = vsel %vm1013_vm10, %v1014_v29, %v1012_v28  ;;  %vm1656_vm1 = vcmp.eq.f32.partialorder %v1653_v25, inf  ;;  %vm3062_vm10 = vmxor %vm3037_vm11, %vm2783_vm9 }
 0x119   : > { %v1030_v35 = vmin.f32 %v1015_v31, 30.0  ;;  %v1659_v52 = vand.u32 2147483648, %v1653_v25  ;;  %vm1658_vm2 = vcmp.eq.f32.partialorder %v1653_v25, 0.0  ;;  %v1016_v4 = vmin.f32 %v1015_v31, 10.0  ;;  %v1836_v31 = vld [vmem:[%s745_s29] sm:$0x7] }
 0x11a   : > { %v2578_v32 = vpop.eup %2577  ;;  %v1753_v33 = vadd.f32 1e-10, %v1752_v30  ;;  %v3095_v30 = vld [vmem:[%s753_s16] sm:$0x7] }
 0x11b   : > { %v1264_v37 = vmul.f32 %v2578_v32, %v1262_v63  ;;  %v1031_v40 = vsel %vm3037_vm11, %v1030_v35, 0.0  ;;  %v1017_v9 = vsel %vm3062_vm10, %v1016_v4, 0.0 }
 0x11c   : > { %2583 = vrsqrt.f32 %v1753_v33  ;;  %v3044_v42 = vsel %vm1018_vm12, %v1031_v40, 0.0  ;;  %vm1756_vm7 = vcmp.eq.f32.partialorder %v1753_v33, inf  ;;  %v1759_v60 = vand.u32 2147483648, %v1753_v33 }
 0x11d   : > { %v1266_v39 = vsel %vm1265_vm13, %v1262_v63, %v1264_v37  ;;  %2585 = vpow2.f32 %v1804_v36  ;;  %vm1758_vm8 = vcmp.eq.f32.partialorder %v1753_v33, 0.0  ;;  %v1019_v15 = vsel %vm1018_vm12, %v1017_v9, 0.0 }
 0x11e   : > { %v1269_v41 = vsel %vm1267_vm14, %v1268_v38, %v1266_v39 }
 0x11f   : > { %v1283_v43 = vmin.f32 %v1269_v41, 30.0  ;;  %v1270_v11 = vmin.f32 %v1269_v41, 10.0 }
 0x120   : > { %v2580_v44 = vpop.eup %2579 }
 0x121   : > { %v1517_v45 = vmul.f32 %v2580_v44, %v1515_v19  ;;  %v1284_v46 = vsel %vm3037_vm11, %v1283_v43, 0.0  ;;  %v1271_v18 = vsel %vm3062_vm10, %v1270_v11, 0.0 }
 0x122   : > { %v2582_v47 = vpop.eup %2581  ;;  %v3049_v49 = vsel %vm1018_vm12, %v1284_v46, 0.0  ;;  %v1272_v24 = vsel %vm1018_vm12, %v1271_v18, 0.0 }
 0x123   : > { %v1655_v50 = vmul.f32 %v2582_v47, %v1653_v25  ;;  %v1519_v51 = vsel %vm1518_vm15, %v1515_v19, %v1517_v45 }
 0x124   : > { %v1522_v53 = vsel %vm1520_vm0, %v1521_v48, %v1519_v51 }
 0x125   : > { %v1657_v54 = vsel %vm1656_vm1, %v1653_v25, %v1655_v50  ;;  %v1536_v55 = vmin.f32 %v1522_v53, 30.0  ;;  %v1523_v19 = vmin.f32 %v1522_v53, 10.0 }
 0x126   : > { %v2584_v56 = vpop.eup %2583  ;;  %v1660_v57 = vsel %vm1658_vm2, %v1659_v52, %v1657_v54 }
 0x127   : > { %vm1761_vm4 = vcmp.lt.f32.partialorder %v1660_v57, 15.0  ;;  %v1755_v58 = vmul.f32 %v2584_v56, %v1753_v33  ;;  %v1537_v59 = vsel %vm3037_vm11, %v1536_v55, 0.0  ;;  %v2586_v62 = vpop.eup %2585  ;;  %v1524_v25 = vsel %vm3062_vm10, %v1523_v19, 0.0 }
 0x128   : > { %vm1763_vm6 = vmand %vm1761_vm4, %vm1762_vm3  ;;  %v3056_v61 = vsel %vm1018_vm12, %v1537_v59, 0.0  ;;  %v1806_v7 = vsel %vm1799_vm5, %v2586_v62, 0.0  ;;  %v1525_v28 = vsel %vm1018_vm12, %v1524_v25, 0.0 }
 0x129   : > { %v1764_v63 = vsel %vm1763_vm6, 1.0, %v2781_v0  ;;  %v1757_v1 = vsel %vm1756_vm7, %v1753_v33, %v1755_v58  ;;  %v3103_v33 = vld [vmem:[%s757_s3] sm:$0x7] }
 0x12a   : > { %v1783_v2 = vsel %vm1018_vm12, %v1764_v63, 0.0  ;;  %v1760_v3 = vsel %vm1758_vm8, %v1759_v60, %v1757_v1  ;;  %v1876_v36 = vsub.f32 %v3095_v30, %v3103_v33  ;;  %v1898_v25 = vsub.f32 %v3103_v33, %v3095_v30 }
 0x12b   : > { %1784 = vadd.xlane.f32.xlu1 %v1783_v2  ;;  %v1765_v5 = vsub.f32 %v1660_v57, %v1760_v3 }
 0x12c   : > { %v1877_v39 = vmul.f32 %v1876_v36, %v1876_v36 }
 0x12d   : > { %v1766_v8 = vand.u32 2147483647, %v1765_v5 }
 0x12f   : > { %1807 = vadd.xlane.f32.xlu1 %v1806_v7  ;;  %vm1767_vm13 = vcmp.lt.f32.partialorder %v1766_v8, 0.5  ;;  %vm1770_vm14 = vcmp.lt.f32.partialorder %v1766_v8, 1.0  ;;  %vm1774_vm15 = vcmp.lt.f32.partialorder %v1766_v8, 2.0  ;;  %vm1778_vm11 = vcmp.lt.f32.partialorder %v1766_v8, 4.0 }
 0x130   : > { %v2388_v12 = vsel %vm1767_vm13, 1.0, %v2781_v0  ;;  %v2389_v13 = vsel %vm1770_vm14, 1.0, %v2781_v0  ;;  %v2390_v16 = vsel %vm1774_vm15, 1.0, %v2781_v0  ;;  %v2391_v21 = vsel %vm1778_vm11, 1.0, %v2781_v0  ;;  %v3093_v0 = vld [vmem:[%s749_s4] sm:$0x7] }
 0x131   : > { %v1773_v14 = vadd.f32 %v2389_v13, %v2388_v12  ;;  %v1841_v32 = vsub.f32 %v3093_v0, %v3095_v30  ;;  %v3106_v34 = vsub.f32 %v1836_v31, %v3093_v0  ;;  %vm1957_vm11 = vcmask 40960  }
 0x133   : > { %1020 = vadd.xlane.f32.xlu1 %v1019_v15  ;;  %v1777_v20 = vadd.f32 %v2390_v16, %v1773_v14  ;;  %v1842_v35 = vmul.f32 %v1841_v32, %v1841_v32  ;;  %v1860_v37 = vmul.f32 %v3106_v34, %v3106_v34 }
 0x135   : > { %v1781_v22 = vadd.f32 %v2391_v21, %v1777_v20  ;;  %v1895_v20 = vsub.f32 %v3095_v30, %v3093_v0 }
 0x137   : > { %1273 = vadd.xlane.f32.xlu1 %v1272_v24  ;;  %v1782_v26 = vmul.f32 0.25, %v1781_v22 }
 0x139   : > { %v1789_v27 = vmul.f32 %v1782_v26, %v1764_v63 }
 0x13b   : > { %1526 = vadd.xlane.f32.xlu1 %v1525_v28  ;;  %v1790_v29 = vsel %vm1018_vm12, %v1789_v27, 0.0  ;;  %vm1843_vm12 = vcmask 43008  }
 0x13c   : > { %1791 = vadd.xlane.f32.xlu0 %v1790_v29  ;;  %v1844_v38 = vsel %vm1843_vm12, %v1842_v35, 0.0  ;;  %v1861_v40 = vsel %vm1843_vm12, %v1860_v37, 0.0  ;;  %v1878_v44 = vsel %vm1843_vm12, %v1877_v39, 0.0 }
 0x13d   : > { %v1845_v41 = vrot.slane %v1844_v38, 4  ;;  %v1862_v43 = vrot.slane %v1861_v40, 4  ;;  %v1879_v46 = vrot.slane %v1878_v44, 4 }
 0x13f   : > { %v1846_v45 = vadd.f32 %v1845_v41, %v1844_v38  ;;  %v1863_v47 = vadd.f32 %v1862_v43, %v1861_v40  ;;  %v1880_v50 = vadd.f32 %v1879_v46, %v1878_v44 }
 0x141   : > { %v1847_v48 = vrot.slane %v1846_v45, 2  ;;  %v1864_v51 = vrot.slane %v1863_v47, 2  ;;  %v1881_v53 = vrot.slane %v1880_v50, 2 }
 0x143   : > { %v1848_v52 = vadd.f32 %v1847_v48, %v1846_v45  ;;  %v1865_v54 = vadd.f32 %v1864_v51, %v1863_v47  ;;  %v1882_v56 = vadd.f32 %v1881_v53, %v1880_v50 }
 0x145   : > { %v1849_v55 = vrot.slane %v1848_v52, 1  ;;  %v1866_v57 = vrot.slane %v1865_v54, 1  ;;  %v1883_v59 = vrot.slane %v1882_v56, 1 }
 0x147   : > { %v1850_v58 = vadd.f32 %v1849_v55, %v1848_v52  ;;  %v1867_v60 = vadd.f32 %v1866_v57, %v1865_v54  ;;  %v1884_v63 = vadd.f32 %v1883_v59, %v1882_v56 }
 0x149   : > { %v1851_v62 = vadd.f32 1e-06, %v1850_v58  ;;  %v1868_v1 = vadd.f32 1e-06, %v1867_v60  ;;  %v1885_v2 = vadd.f32 1e-06, %v1884_v63 }
 0x14b   : > { %2587 = vrsqrt.f32 %v1851_v62  ;;  %vm1854_vm0 = vcmp.eq.f32.partialorder %v1851_v62, inf  ;;  %vm1871_vm1 = vcmp.eq.f32.partialorder %v1868_v1, inf  ;;  %v1857_v8 = vand.u32 2147483648, %v1851_v62 }
 0x14c   : > { %2589 = vrsqrt.f32 %v1868_v1  ;;  %vm1856_vm2 = vcmp.eq.f32.partialorder %v1851_v62, 0.0  ;;  %v1874_v11 = vand.u32 2147483648, %v1868_v1  ;;  %vm1873_vm3 = vcmp.eq.f32.partialorder %v1868_v1, 0.0 }
 0x14d   : > { %2591 = vrsqrt.f32 %v1885_v2  ;;  %vm1888_vm4 = vcmp.eq.f32.partialorder %v1885_v2, inf  ;;  %v1891_v15 = vand.u32 2147483648, %v1885_v2  ;;  %vm1890_vm6 = vcmp.eq.f32.partialorder %v1885_v2, 0.0 }
 0x155   : > { %v2588_v3 = vpop.eup %2587 }
 0x156   : > { %v2590_v4 = vpop.eup %2589  ;;  %v1853_v5 = vmul.f32 %v2588_v3, %v1851_v62 }
 0x157   : > { %v2592_v6 = vpop.eup %2591  ;;  %v1870_v7 = vmul.f32 %v2590_v4, %v1868_v1 }
 0x158   : > { %v1855_v9 = vsel %vm1854_vm0, %v1851_v62, %v1853_v5  ;;  %v1887_v12 = vmul.f32 %v2592_v6, %v1885_v2 }
 0x159   : > { %v1872_v13 = vsel %vm1871_vm1, %v1868_v1, %v1870_v7  ;;  %v1858_v14 = vsel %vm1856_vm2, %v1857_v8, %v1855_v9 }
 0x15a   : > { %v1875_v16 = vsel %vm1873_vm3, %v1874_v11, %v1872_v13  ;;  %v1889_v18 = vsel %vm1888_vm4, %v1885_v2, %v1887_v12  ;;  %2593 = vrcp.f32 %v1858_v14 }
 0x15b   : > { %v1892_v19 = vsel %vm1890_vm6, %v1891_v15, %v1889_v18  ;;  %2595 = vrcp.f32 %v1875_v16 }
 0x15c   : > { %2597 = vrcp.f32 %v1892_v19 }
 0x164   : > { %v2594_v21 = vpop.eup %2593 }
 0x165   : > { %v2596_v22 = vpop.eup %2595  ;;  %v1897_v24 = vmul.f32 %v2594_v21, %v1895_v20 }
 0x166   : > { %v2598_v26 = vpop.eup %2597  ;;  %v1894_v27 = vmul.f32 %v2596_v22, %v3106_v34  ;;  %v2392_v34 = vadd.f32 -1.329, %v1858_v14 }
 0x167   : > { %v1900_v28 = vmul.f32 %v2598_v26, %v1898_v25  ;;  %v1933_v29 = vsub.f32 0.0, %v1897_v24 }
 0x168   : > { %v1913_v31 = vmul.f32 %v1897_v24, %v1894_v27  ;;  %v1902_v48 = vmul.f32 %v2392_v34, %v2392_v34 }
 0x169   : > { %v1934_v32 = vmul.f32 %v1933_v29, %v1900_v28 }
 0x16a   : > { %v1914_v35 = vsel %vm1843_vm12, %v1913_v31, 0.0  ;;  %v1903_v53 = vadd.f32 1e-06, %v1902_v48 }
 0x16b   : > { %v1915_v36 = vrot.slane %v1914_v35, 4  ;;  %v1935_v37 = vsel %vm1843_vm12, %v1934_v32, 0.0 }
 0x16c   : > { %v1936_v38 = vrot.slane %v1935_v37, 4  ;;  %2599 = vrsqrt.f32 %v1903_v53  ;;  %vm1906_vm7 = vcmp.eq.f32.partialorder %v1903_v53, inf  ;;  %vm1908_vm9 = vcmp.eq.f32.partialorder %v1903_v53, 0.0 }
 0x16d   : > { %v1916_v0 = vadd.f32 %v1915_v36, %v1914_v35  ;;  %v1909_v14 = vand.u32 2147483648, %v1903_v53 }
 0x16e   : > { %v1937_v39 = vadd.f32 %v1936_v38, %v1935_v37 }
 0x16f   : > { %v1917_v40 = vrot.slane %v1916_v0, 2 }
 0x170   : > { %v1938_v41 = vrot.slane %v1937_v39, 2 }
 0x171   : > { %v1918_v43 = vadd.f32 %v1917_v40, %v1916_v0 }
 0x172   : > { %v1939_v44 = vadd.f32 %v1938_v41, %v1937_v39 }
 0x173   : > { %v1919_v30 = vrot.slane %v1918_v43, 1 }
 0x174   : > { %v1940_v33 = vrot.slane %v1939_v44, 1 }
 0x175   : > { %v1920_v45 = vadd.f32 %v1919_v30, %v1918_v43 }
 0x176   : > { %v1941_v46 = vadd.f32 %v1940_v33, %v1939_v44  ;;  %v2600_v1 = vpop.eup %2599  ;;  %v1840_v44 = vld [vmem:[%s3302_s11] sm:$0x1] }
 0x177   : > { %v1921_v47 = vadd.f32 0.4473, %v1920_v45  ;;  %v1905_v8 = vmul.f32 %v2600_v1, %v1903_v53 }
 0x178   : > { %v1942_v50 = vadd.f32 0.5203, %v1941_v46 }
 0x179   : > { %v1922_v51 = vmul.f32 %v1921_v47, %v1921_v47  ;;  %v1907_v18 = vsel %vm1906_vm7, %v1903_v53, %v1905_v8 }
 0x17a   : > { %v1943_v54 = vmul.f32 %v1942_v50, %v1942_v50  ;;  %v1910_v22 = vsel %vm1908_vm9, %v1909_v14, %v1907_v18 }
 0x17b   : > { %v1923_v55 = vadd.f32 1e-06, %v1922_v51  ;;  %v2393_v29 = vadd.f32 -0.168, %v1910_v22 }
 0x17c   : > { %v1944_v57 = vadd.f32 1e-06, %v1943_v54 }
 0x17d   : > { %2601 = vrsqrt.f32 %v1923_v55  ;;  %vm1926_vm8 = vcmp.eq.f32.partialorder %v1923_v55, inf  ;;  %vm1928_vm10 = vcmp.eq.f32.partialorder %v1923_v55, 0.0  ;;  %v1929_v15 = vand.u32 2147483648, %v1923_v55 }
 0x17e   : > { %2603 = vrsqrt.f32 %v1944_v57  ;;  %vm1947_vm13 = vcmp.eq.f32.partialorder %v1944_v57, inf  ;;  %v1950_v25 = vand.u32 2147483648, %v1944_v57  ;;  %vm1949_vm14 = vcmp.eq.f32.partialorder %v1944_v57, 0.0 }
 0x17f   : > { %v1912_v36 = vmax.f32 %v2393_v29, 0.0 }
 0x187   : > { %v2602_v2 = vpop.eup %2601 }
 0x188   : > { %v2604_v6 = vpop.eup %2603  ;;  %v1925_v9 = vmul.f32 %v2602_v2, %v1923_v55 }
 0x189   : > { %v1946_v20 = vmul.f32 %v2604_v6, %v1944_v57 }
 0x18a   : > { %v1927_v19 = vsel %vm1926_vm8, %v1923_v55, %v1925_v9 }
 0x18b   : > { %v1930_v24 = vsel %vm1928_vm10, %v1929_v15, %v1927_v19  ;;  %v1948_v27 = vsel %vm1947_vm13, %v1944_v57, %v1946_v20 }
 0x18c   : > { %v2394_v31 = vadd.f32 -0.168, %v1930_v24  ;;  %v1951_v32 = vsel %vm1949_vm14, %v1950_v25, %v1948_v27 }
 0x18d   : > { %v2395_v38 = vadd.f32 -0.36, %v1951_v32 }
 0x18e   : > { %v1932_v37 = vmax.f32 %v2394_v31, 0.0 }
 0x18f   : > { %v1953_v40 = vmax.f32 %v2395_v38, 0.0 }
 0x190   : > { %v1954_v41 = vadd.f32 %v1932_v37, %v1912_v36 }
 0x192   : > { %v1955_v43 = vadd.f32 %v1954_v41, %v1953_v40 }
 0x1b8   : > { %v1785_v52 = vpop.xlane.xlu1 %1784 }
 0x1b9   : > { %v1786_v58 = vadd.f32 1e-10, %v1785_v52 }
 0x1bb   : > { %2605 = vrcp.f32 %v1786_v58 }
 0x1bc   : > { %v3122_v56 = vpop.xlane.xlu1 %1807 }
 0x1bd   : > { %2607 = vlog2.f32 %v3122_v56 }
 0x1c0   : > { %v1021_v59 = vpop.xlane.xlu1 %1020 }
 0x1c1   : > { %v1022_v60 = vrot.slane %v1021_v59, 4 }
 0x1c3   : > { %v1023_v62 = vadd.f32 %v1022_v60, %v1021_v59 }
 0x1c5   : > { %v1024_v63 = vrot.slane %v1023_v62, 2  ;;  %v2606_v11 = vpop.eup %2605 }
 0x1c7   : > { %v1025_v3 = vadd.f32 %v1024_v63, %v1023_v62  ;;  %v2608_v33 = vpop.eup %2607 }
 0x1c8   : > { %v1810_v45 = vmul.f32 0.6931472, %v2608_v33 }
 0x1c9   : > { %v1792_v4 = vpop.xlane.xlu0 %1791  ;;  %v1026_v5 = vrot.slane %v1025_v3, 1 }
 0x1ca   : > { %v1793_v7 = vadd.f32 1e-10, %v1792_v4  ;;  %v1811_v46 = vadd.f32 %v1810_v45, %v3029_v23 }
 0x1cb   : > { %v1027_v12 = vadd.f32 %v1026_v5, %v1025_v3 }
 0x1cc   : > { %v1794_v13 = vmul.f32 %v2606_v11, %v1793_v7 }
 0x1cd   : > { %2484 = vpush %v1027_v12 }
 0x1ce   : > { %v1795_v16 = vmul.f32 50.0, %v1794_v13 }
 0x1d0   : > { %v1796_v21 = vfloor.f32 %v1795_v16 }
 0x1d2   : > { %v1797_v26 = vmin.f32 %v1796_v21, 49.0 }
 0x1d4   : > { %v2496_v28 = vtrunc.f32 %v1797_v26 }
 0x1d6   : > { %v2497_v35 = vcvt.f32.s32 %v2496_v28 }
 0x1d8   : > { %vm1812_vm15 = vcmp.eq.s32.totalorder %v3027_v17, %v2497_v35  ;;  %v1956_v17 = vmul.f32 %v1955_v43, %v1840_v44 }
 0x1d9   : > { %v1813_v0 = vsel %vm1812_vm15, %v3006_v10, 0.0  ;;  %v1274_v10 = vpop.xlane.xlu1 %1273 }
 0x1da   : > { %v1814_v39 = vsel %vm1799_vm5, %v1813_v0, 0.0  ;;  %v1958_v30 = vsel %vm1957_vm11, %v1956_v17, 0.0  ;;  %v1275_v34 = vrot.slane %v1274_v10, 4  ;;  %vm1819_vm5 = vcmask 7168  }
 0x1db   : > { %1815 = vadd.xlane.f32.xlu0 %v1814_v39 }
 0x1dc   : > { %v1276_v47 = vadd.f32 %v1275_v34, %v1274_v10 }
 0x1de   : > { %v1277_v52 = vrot.slane %v1276_v47, 2 }
 0x1df   : > { %1033 = vadd.xlane.f32.xlu0 %v3044_v42  ;;  %v1527_v42 = vpop.xlane.xlu1 %1526 }
 0x1e0   : > { %v1528_v48 = vrot.slane %v1527_v42, 4  ;;  %v1278_v58 = vadd.f32 %v1277_v52, %v1276_v47 }
 0x1e2   : > { %v1529_v53 = vadd.f32 %v1528_v48, %v1527_v42  ;;  %v1279_v1 = vrot.slane %v1278_v58, 1 }
 0x1e3   : > { %1286 = vadd.xlane.f32.xlu0 %v3049_v49 }
 0x1e4   : > { %v1530_v56 = vrot.slane %v1529_v53, 2  ;;  %v1280_v9 = vadd.f32 %v1279_v1, %v1278_v58 }
 0x1e6   : > { %v1531_v2 = vadd.f32 %v1530_v56, %v1529_v53 }
 0x1e7   : > { %1539 = vadd.xlane.f32.xlu0 %v3056_v61 }
 0x1e8   : > { %v1532_v11 = vrot.slane %v1531_v2, 1 }
 0x1ea   : > { %v1533_v16 = vadd.f32 %v1532_v11, %v1531_v2 }
 0x1eb   : > { %1959 = vadd.xlane.f32.xlu0 %v1958_v30 }
 0x1fe   : > { %s2485_s25 = spop %2484 }
 0x268   : > { %v1816_v50 = vpop.xlane.xlu0 %1815 }
 0x269   : > { %v1817_v49 = vsub.f32 %v1811_v46, %v1816_v50 }
 0x26b   : > { %v1820_v51 = vsel %vm1819_vm5, %v1817_v49, 0.0 }
 0x26c   : > { %1821 = vadd.xlane.f32.xlu1 %v1820_v51  ;;  %v1034_v61 = vpop.xlane.xlu0 %1033 }
 0x26d   : > { %v1035_v54 = vrot.slane %v1034_v61, 4 }
 0x26f   : > { %v1036_v55 = vadd.f32 %v1035_v54, %v1034_v61 }
 0x270   : > { %v1287_v57 = vpop.xlane.xlu0 %1286 }
 0x271   : > { %v1037_v59 = vrot.slane %v1036_v55, 2  ;;  %v1288_v60 = vrot.slane %v1287_v57, 4 }
 0x273   : > { %v1289_v62 = vadd.f32 %v1288_v60, %v1287_v57  ;;  %v1038_v63 = vadd.f32 %v1037_v59, %v1036_v55 }
 0x274   : > { %v1540_v23 = vpop.xlane.xlu0 %1539 }
 0x275   : > { %v1290_v3 = vrot.slane %v1289_v62, 2  ;;  %v1541_v4 = vrot.slane %v1540_v23, 4  ;;  %v1039_v5 = vrot.slane %v1038_v63, 1 }
 0x277   : > { %v1542_v6 = vadd.f32 %v1541_v4, %v1540_v23  ;;  %v1040_v7 = vadd.f32 %v1039_v5, %v1038_v63  ;;  %v1291_v8 = vadd.f32 %v1290_v3, %v1289_v62 }
 0x279   : > { %v1543_v12 = vrot.slane %v1542_v6, 2  ;;  %2486 = vpush %v1040_v7  ;;  %v1292_v13 = vrot.slane %v1291_v8, 1 }
 0x27a   : > { %2488 = vpush %v1280_v9 }
 0x27b   : > { %v1293_v14 = vadd.f32 %v1292_v13, %v1291_v8  ;;  %v1544_v15 = vadd.f32 %v1543_v12, %v1542_v6 }
 0x27d   : > { %2490 = vpush %v1293_v14  ;;  %v1545_v18 = vrot.slane %v1544_v15, 1 }
 0x27e   : > { %2492 = vpush %v1533_v16 }
 0x27f   : > { %v1546_v19 = vadd.f32 %v1545_v18, %v1544_v15 }
 0x281   : > { %2494 = vpush %v1546_v19 }
 0x2aa   : > { %s2487_s0 = spop %2486 }
 0x2ab   : > { %s2489_s4 = spop %2488 }
 0x2ac   : > { %s1282_s26 = sadd.f32 %s2489_s4, %s2485_s25 }
 0x2ae   : > { %s2491_s16 = spop %2490 }
 0x2af   : > { %s2493_s17 = spop %2492  ;;  %s1295_s29 = sadd.f32 %s2491_s16, %s2487_s0 }
 0x2b0   : > { %s1535_s27 = sadd.f32 %s2493_s17, %s1282_s26  ;;  %s3156_s0 = scalar_lea.hbm %s3304_s13, %s3150_s8 }
 0x2b1   : > { %s2019_s26 = sshll.u32 %s685_s5, 4  ;;  %s1981_s16 = scalar_lea.sflag [#allocation5], %s3147_s7  ;;  %s2020_s26 = int_to_ptr.vmem [resolvable:$true] %s2019_s26 }
 0x2b2   : > { %v1549_v20 = vstv %s1535_s27  ;;  %s2495_s24 = spop %2494  ;;  %s2609_s17 = scalar_lea.vmem %s2020_s26, 128 }
 0x2b3   : > { %1550 = vst [vmem:[%s678_s2] sm:$0xff] %v1549_v20  ;;  %s1548_s3 = sadd.f32 %s2495_s24, %s1295_s29  ;;  %p2610_p12 = scmp.ne.s32.totalorder %s2020_s26, %s2609_s17 }
 0x2b4   : > { %s2784_s27 = smov [#allocation4]  }
 0x2b5   : > { %v1551_v21 = vstv %s1548_s3  ;;  %p2611_p13 = pnand %p2610_p12, %p2910_p4  ;;  %s2613_s6 = sshll.u32 %s2784_s27, 4  ;;  %s2614_s6 = int_to_ptr.vmem [resolvable:$false] %s2613_s6 }
 0x2b6   : > { %1552 = vst [vmem:[%s685_s5] sm:$0xff] %v1551_v21  ;;  %s2615_s29 = scalar_lea.vmem %s2614_s6, 256  ;;  %p2616_p1 = scmp.lt.s32.totalorder %s2020_s26, %s2614_s6 }
 0x2b7   : > { %p2612_p0 = pneg %p2611_p13  ;;  %p2617_p2 = scmp.lt.s32.totalorder %s2615_s29, %s2609_s17 }
 0x2b9   : > { %p2618_p3 = por %p2617_p2, %p2616_p1 }
 0x2bb   : > { %p2619_p5 = pnand %p2618_p3, %p2612_p0 }
 0x2bd   : > { %2622 = shalt.err (!%p2619_p5)
}
 0x2be   : > { %s2623_s5 = scalar_lea.hbm %s3156_s0, 128  ;;  %s2627_s3 = scalar_lea.hbm %s3304_s13, 256 }
 0x2bf   : > { %p2624_p6 = scmp.ne.s32.totalorder %s3156_s0, %s2623_s5  ;;  %p2628_p10 = scmp.lt.u32.totalorder %s3156_s0, %s3304_s13 }
 0x2c0   : > { %p2629_p11 = scmp.lt.u32.totalorder %s2627_s3, %s2623_s5  ;;  %p2631_p13 = scmp.lt.u32.totalorder %s2623_s5, %s3156_s0 }
 0x2c1   : > { %p2625_p7 = pnand %p2624_p6, %p2910_p4 }
 0x2c2   : > { %p2630_p12 = por %p2629_p11, %p2628_p10 }
 0x2c3   : > { %p2626_p9 = pneg %p2625_p7 }
 0x2c4   : > { %p2632_p0 = por %p2631_p13, %p2630_p12 }
 0x2c6   : > { %p2633_p1 = pnand %p2632_p0, %p2626_p9 }
 0x2c8   : > { %2636 = shalt.err (!%p2633_p1)
}
 0x2c9   : > { %2503 = dma.vmem_to_hbm [thread:$0]  (%p2910_p4), %s2020_s26, 128, %s3156_s0, %s1981_s16  }
 0x2ca   : > { %s3182_s6 = scalar_lea.hbm %s3303_s12, %s3150_s8  ;;  %s2005_s29 = sshll.u32 %s678_s2, 4  ;;  %s2006_s29 = int_to_ptr.vmem [resolvable:$true] %s2005_s29 }
 0x2cb   : > { %s1976_s5 = scalar_lea.sflag [#allocation3], %s3136_s1  ;;  %s2637_s21 = scalar_lea.vmem %s2006_s29, 128 }
 0x2cc   : > { %p2638_p2 = scmp.ne.s32.totalorder %s2006_s29, %s2637_s21  ;;  %s2785_s24 = smov [#allocation2]  }
 0x2cd   : > { %s2641_s3 = sshll.u32 %s2785_s24, 4  ;;  %s2642_s3 = int_to_ptr.vmem [resolvable:$false] %s2641_s3 }
 0x2ce   : > { %p2639_p3 = pnand %p2638_p2, %p2910_p4  ;;  %s2643_s25 = scalar_lea.vmem %s2642_s3, 256 }
 0x2cf   : > { %p2644_p6 = scmp.lt.s32.totalorder %s2006_s29, %s2642_s3  ;;  %p2645_p7 = scmp.lt.s32.totalorder %s2643_s25, %s2637_s21 }
 0x2d0   : > { %p2640_p5 = pneg %p2639_p3 }
 0x2d1   : > { %p2646_p9 = por %p2645_p7, %p2644_p6 }
 0x2d3   : > { %p2647_p10 = pnand %p2646_p9, %p2640_p5 }
 0x2d5   : > { %2650 = shalt.err (!%p2647_p10)
}
 0x2d6   : > { %s2651_s2 = scalar_lea.hbm %s3182_s6, 128  ;;  %s2655_s4 = scalar_lea.hbm %s3303_s12, 256 }
 0x2d7   : > { %p2652_p11 = scmp.ne.s32.totalorder %s3182_s6, %s2651_s2  ;;  %p2656_p0 = scmp.lt.u32.totalorder %s3182_s6, %s3303_s12 }
 0x2d8   : > { %p2657_p1 = scmp.lt.u32.totalorder %s2655_s4, %s2651_s2  ;;  %p2659_p3 = scmp.lt.u32.totalorder %s2651_s2, %s3182_s6 }
 0x2d9   : > { %p2653_p12 = pnand %p2652_p11, %p2910_p4 }
 0x2da   : > { %p2658_p2 = por %p2657_p1, %p2656_p0 }
 0x2db   : > { %p2654_p13 = pneg %p2653_p12 }
 0x2dc   : > { %p2660_p5 = por %p2659_p3, %p2658_p2 }
 0x2de   : > { %p2661_p6 = pnand %p2660_p5, %p2654_p13 }
 0x2e0   : > { %2664 = shalt.err (!%p2661_p6)
}
 0x2e1   : > { %2502 = dma.vmem_to_hbm [thread:$0]  (%p2910_p4), %s2006_s29, 128, %s3182_s6, %s1976_s5   ;;  %v1960_v22 = vpop.xlane.xlu0 %1959 }
 0x2e2   : > { %v1961_v24 = vrot.slane %v1960_v22, 4  ;;  %s692_s6 = scalar_lea.vmem [#allocation6], %s3139_s22  ;;  %s699_s5 = scalar_lea.vmem [#allocation7], %s3139_s22 }
 0x2e3   : > { %s2033_s29 = sshll.u32 %s692_s6, 4  ;;  %s2047_s21 = sshll.u32 %s699_s5, 4  ;;  %s3206_s29 = int_to_ptr.vmem [resolvable:$true] %s2033_s29  ;;  %s3208_s21 = int_to_ptr.vmem [resolvable:$true] %s2047_s21 }
 0x2e4   : > { %v1962_v25 = vadd.f32 %v1961_v24, %v1960_v22  ;;  %s3214_s25 = scalar_lea.hbm %s3305_s14, %s3150_s8  ;;  %s3220_s22 = scalar_lea.hbm %s3306_s15, %s3150_s8 }
 0x2e5   : > { %s2665_s17 = scalar_lea.vmem %s3206_s29, 128  ;;  %s2786_s27 = smov [#allocation6]  }
 0x2e6   : > { %v1963_v26 = vrot.slane %v1962_v25, 2  ;;  %p2666_p7 = scmp.ne.s32.totalorder %s3206_s29, %s2665_s17  ;;  %s2669_s24 = sshll.u32 %s2786_s27, 4  ;;  %s2670_s24 = int_to_ptr.vmem [resolvable:$false] %s2669_s24 }
 0x2e7   : > { %s2671_s3 = scalar_lea.vmem %s2670_s24, 256  ;;  %p2672_p11 = scmp.lt.s32.totalorder %s3206_s29, %s2670_s24 }
 0x2e8   : > { %v1964_v31 = vadd.f32 %v1963_v26, %v1962_v25  ;;  %p2667_p9 = pnand %p2666_p7, %p2910_p4  ;;  %p2673_p12 = scmp.lt.s32.totalorder %s2671_s3, %s2665_s17 }
 0x2ea   : > { %v1965_v36 = vrot.slane %v1964_v31, 1  ;;  %p2668_p10 = pneg %p2667_p9  ;;  %p2674_p13 = por %p2673_p12, %p2672_p11 }
 0x2ec   : > { %v1966_v0 = vadd.f32 %v1965_v36, %v1964_v31  ;;  %p2675_p0 = pnand %p2674_p13, %p2668_p10 }
 0x2f9   : > { %v1822_v27 = vpop.xlane.xlu1 %1821 }
 0x2fa   : > { %v1823_v28 = vrot.slane %v1822_v27, 4 }
 0x2fc   : > { %v1824_v29 = vadd.f32 %v1823_v28, %v1822_v27 }
 0x2fe   : > { %v1825_v32 = vrot.slane %v1824_v29, 2 }
 0x300   : > { %v1826_v35 = vadd.f32 %v1825_v32, %v1824_v29 }
 0x302   : > { %v1827_v37 = vrot.slane %v1826_v35, 1 }
 0x304   : > { %v1828_v38 = vadd.f32 %v1827_v37, %v1826_v35 }
 0x306   : > { %2498 = vpush %v1828_v38 }
 0x307   : > { %2500 = vpush %v1966_v0 }
 0x337   : > { %s2499_s2 = spop %2498 }
 0x338   : > { %v1830_v39 = vstv %s2499_s2  ;;  %s2501_s0 = spop %2500 }
 0x339   : > { %1831 = vst [vmem:[%s692_s6] sm:$0xff] %v1830_v39  ;;  %v1968_v40 = vstv %s2501_s0 }
 0x33a   : > { %1969 = vst [vmem:[%s699_s5] sm:$0xff] %v1968_v40 }
 0x33b   : > { %2678 = shalt.err (!%p2675_p0)
}
 0x33c   : > { %s2679_s8 = scalar_lea.hbm %s3214_s25, 128  ;;  %s2683_s2 = scalar_lea.hbm %s3305_s14, 256 }
 0x33d   : > { %p2680_p1 = scmp.ne.s32.totalorder %s3214_s25, %s2679_s8  ;;  %p2684_p5 = scmp.lt.u32.totalorder %s3214_s25, %s3305_s14 }
 0x33e   : > { %p2685_p6 = scmp.lt.u32.totalorder %s2683_s2, %s2679_s8  ;;  %p2687_p9 = scmp.lt.u32.totalorder %s2679_s8, %s3214_s25 }
 0x33f   : > { %p2681_p2 = pnand %p2680_p1, %p2910_p4 }
 0x340   : > { %p2686_p7 = por %p2685_p6, %p2684_p5 }
 0x341   : > { %p2682_p3 = pneg %p2681_p2 }
 0x342   : > { %p2688_p10 = por %p2687_p9, %p2686_p7 }
 0x344   : > { %p2689_p11 = pnand %p2688_p10, %p2682_p3 }
 0x346   : > { %2692 = shalt.err (!%p2689_p11)
}
 0x347   : > { %2504 = dma.vmem_to_hbm [thread:$0]  (%p2910_p4), %s3206_s29, 128, %s3214_s25, %s1981_s16  }
 0x348   : > { %s1991_s4 = scalar_lea.sflag [#allocation8], %s3136_s1  ;;  %s2693_s17 = scalar_lea.vmem %s3208_s21, 128 }
 0x349   : > { %p2694_p12 = scmp.ne.s32.totalorder %s3208_s21, %s2693_s17  ;;  %s2787_s27 = smov [#allocation7]  }
 0x34a   : > { %s2697_s24 = sshll.u32 %s2787_s27, 4  ;;  %s2698_s24 = int_to_ptr.vmem [resolvable:$false] %s2697_s24 }
 0x34b   : > { %p2695_p13 = pnand %p2694_p12, %p2910_p4  ;;  %s2699_s3 = scalar_lea.vmem %s2698_s24, 256 }
 0x34c   : > { %p2700_p1 = scmp.lt.s32.totalorder %s3208_s21, %s2698_s24  ;;  %p2701_p2 = scmp.lt.s32.totalorder %s2699_s3, %s2693_s17 }
 0x34d   : > { %p2696_p0 = pneg %p2695_p13 }
 0x34e   : > { %p2702_p3 = por %p2701_p2, %p2700_p1 }
 0x350   : > { %p2703_p5 = pnand %p2702_p3, %p2696_p0 }
 0x352   : > { %2706 = shalt.err (!%p2703_p5)
}
 0x353   : > { %s2707_s7 = scalar_lea.hbm %s3220_s22, 128  ;;  %s2711_s29 = scalar_lea.hbm %s3306_s15, 256 }
 0x354   : > { %p2708_p6 = scmp.ne.s32.totalorder %s3220_s22, %s2707_s7  ;;  %p2712_p10 = scmp.lt.u32.totalorder %s3220_s22, %s3306_s15 }
 0x355   : > { %p2713_p11 = scmp.lt.u32.totalorder %s2711_s29, %s2707_s7  ;;  %p2715_p13 = scmp.lt.u32.totalorder %s2707_s7, %s3220_s22 }
 0x356   : > { %p2709_p7 = pnand %p2708_p6, %p2910_p4 }
 0x357   : > { %p2714_p12 = por %p2713_p11, %p2712_p10 }
 0x358   : > { %p2710_p9 = pneg %p2709_p7 }
 0x359   : > { %p2716_p0 = por %p2715_p13, %p2714_p12 }
 0x35b   : > { %p2717_p1 = pnand %p2716_p0, %p2710_p9 }
 0x35d   : > { %2720 = shalt.err (!%p2717_p1)
}
 0x35e   : > { %2505 = dma.vmem_to_hbm [thread:$0]  (%p2910_p4), %s3208_s21, 128, %s3220_s22, %s1991_s4  }
 0x35f PF: > { %p2523_p2 = scmp.ge.s32.totalorder %s2779_s23, 2  ;;  %s2059_s6 = sand.u32 1, %s2759_s18  }
 0x360   : > { %s2060_s5 = scalar_lea.sflag [#allocation3], %s2059_s6 }
 0x361   : > { %p2511_p3 = pnand %p2523_p2, %p2919_p8 }
 0x363   : > { %2746 = dma.done.wait (!%p2511_p3), %s2060_s5, 128  }
 0x364   : > { %2748 = vsyncadd (!%p2511_p3), %s2060_s5, 4294967168  ;;  %s3339_s2 = sadd.s32 4294967294, %s2779_s23  }
 0x365   : > { %s2068_s0 = sand.u32 1, %s3339_s2  }
 0x366   : > { %s2069_s26 = scalar_lea.sflag [#allocation5], %s2068_s0 }
 0x367   : > { %2750 = dma.done.wait (!%p2511_p3), %s2069_s26, 256  }
 0x368   : > { %2752 = vsyncadd (!%p2511_p3), %s2069_s26, 4294967040  ;;  %s2087_s28 = scalar_lea.sflag [#allocation8], %s2059_s6 }
 0x369   : > { %2754 = dma.done.wait (!%p2511_p3), %s2087_s28, 128  }
 0x36a   : > { %2756 = vsyncadd (!%p2511_p3), %s2087_s28, 4294967168  ;;  %s35_s23 = sadd.s32 1, %s2779_s23   ;;  %s3340_s21 = sld [smem:[#allocation14_spill]] }
 0x36b   : > { %p32_p4 = scmp.ge.s32.totalorder %s35_s23, 4   ;;  %s3341_s30 = sld [smem:[#allocation12_spill]] }
 0x36c   : > { %s3342_s22 = sld [smem:[#allocation13_spill]]  ;;  %s3343_s18 = smov %s2763_s19 }
 0x36d   : > { %s3344_s19 = smov %s2767_s20  ;;  %34 = sbr.rel (!%p32_p4) target bundleno = 18 (0x12), region = 190 }
 0x370   : > { %s3345_s20 = smov %s3340_s21 }
 0x371   : > { %s3346_s21 = smov %s3341_s30 }
 0x374   :  { %2092 = vsyncpa [#allocation3], 1 }
 0x375   :  { %2094 = vsyncpa [#allocation3 + $0x1], 1 }
 0x376   :  { %2095 = vsyncpa [#allocation5], 1 }
 0x377   :  { %2097 = vsyncpa [#allocation5 + $0x1], 1 }
 0x378   :  { %2098 = vsyncpa [#allocation8], 1 }
 0x379   :  { %2100 = vsyncpa [#allocation8 + $0x1], 1 }

</bundles_post_ra>
